<compile_context>
chip_gen: v7x
topology: tpu7x:2x2x1
jax: 0.10.0
libtpu: 0.0.40
codegen_flags: <defaults>
</compile_context>

<pallas_src>
import functools

import jax
import jax.numpy as jnp
from jax.experimental import pallas as pl
from jax.experimental.pallas import tpu as pltpu


P = 1000  # DeepONet "p" dimension (hard-coded to 1000 in the PyTorch module).


def _round_up(x, m):
    return ((x + m - 1) // m) * m


# ---------------------------------------------------------------------------
# Kernel: one batch tile of the collapsed forward pass.
# ---------------------------------------------------------------------------
def deeponet_kernel(
    bi_ref,    # [bt, bf]   branch input tile
    ti_ref,    # [bt, tf]   trunk input tile
    g_ref,     # [bf, C]    collapsed bilinear form  (Wb*w_last) @ W5^T
    c_ref,     # [bf, 1]    collapsed bias term      (Wb*w_last) @ b5^T
    w1_ref,    # [tf, C]    trunk layer 1 weight
    wmid_ref,  # [3, C, C]  trunk layers 2..4 weights (stacked)
    bmid_ref,  # [4, C]     trunk layers 1..4 biases  (stacked)
    out_ref,   # [bt, 1]
):
    bi = bi_ref[...]

    # Trunk MLP: 4 x (Linear + tanh).  Hidden width C (<=128 lanes); tanh goes
    # to the EUP, matmuls to the MXU with f32 accumulation.
    h = jnp.tanh(
        jnp.dot(ti_ref[...], w1_ref[...], preferred_element_type=jnp.float32)
        + bmid_ref[0:1, :]
    )
    h = jnp.tanh(
        jnp.dot(h, wmid_ref[0], preferred_element_type=jnp.float32)
        + bmid_ref[1:2, :]
    )
    h = jnp.tanh(
        jnp.dot(h, wmid_ref[1], preferred_element_type=jnp.float32)
        + bmid_ref[2:3, :]
    )
    h = jnp.tanh(
        jnp.dot(h, wmid_ref[2], preferred_element_type=jnp.float32)
        + bmid_ref[3:4, :]
    )

    # Collapsed combine:  out = rowsum((bi @ G) * h) + bi @ c
    # (equivalent to sum_p branch * trunk * w_last over the original P=1000).
    z = jnp.dot(bi, g_ref[...], preferred_element_type=jnp.float32)   # [bt, C]
    out_ref[...] = (
        jnp.sum(z * h, axis=1, keepdims=True)
        + jnp.dot(bi, c_ref[...], preferred_element_type=jnp.float32)
    )


# ---------------------------------------------------------------------------
# Wrapper: batch-tiled pallas_call with resident weights.
# ---------------------------------------------------------------------------
@functools.partial(jax.jit, static_argnames=("block_b",))
def deeponet_forward(branch_input, trunk_input, prepared, *, block_b=1024):
    """Forward pass.  `prepared` comes from prepare_params(params)."""
    B, bf = branch_input.shape
    tf = trunk_input.shape[1]
    C = prepared["W1"].shape[1]

    # Batch tile: multiple of 8 sublanes; pad the batch to a tile multiple.
    bt = min(_round_up(block_b, 8), _round_up(B, 8))
    Bp = _round_up(B, bt)
    if Bp != B:
        branch_input = jnp.pad(branch_input, ((0, Bp - B), (0, 0)))
        trunk_input = jnp.pad(trunk_input, ((0, Bp - B), (0, 0)))

    grid = (Bp // bt,)

    out = pl.pallas_call(
        deeponet_kernel,
        out_shape=jax.ShapeDtypeStruct((Bp, 1), jnp.float32),
        grid=grid,
        in_specs=[
            # Batch-tiled activations (double-buffered by BlockSpec pipeline).
            pl.BlockSpec((bt, bf), lambda i: (i, 0)),
            pl.BlockSpec((bt, tf), lambda i: (i, 0)),
            # Weights: constant index_map -> DMA'd once, VMEM-resident.
            pl.BlockSpec((bf, C), lambda i: (0, 0)),
            pl.BlockSpec((bf, 1), lambda i: (0, 0)),
            pl.BlockSpec((tf, C), lambda i: (0, 0)),
            pl.BlockSpec((3, C, C), lambda i: (0, 0, 0)),
            pl.BlockSpec((4, C), lambda i: (0, 0)),
        ],
        out_specs=pl.BlockSpec((bt, 1), lambda i: (i, 0)),
        compiler_params=pltpu.CompilerParams(
            dimension_semantics=("parallel",),  # megacore: split batch on v7x
        ),
    )(
        branch_input,
        trunk_input,
        prepared["G"],
        prepared["c"],
        prepared["W1"],
        prepared["Wmid"],
        prepared["bmid"],
    )
    return out[:B]


# ---------------------------------------------------------------------------
# Parameter handling.
# ---------------------------------------------------------------------------
def init_params(key, branch_features, trunk_features, common_features):
    """Synthetic parameters matching the PyTorch module's shapes.

    Weights are stored transposed relative to torch.nn.Linear ([in, out]);
    biases as [1, out]; last_layer_weights as [1, P].
    """
    keys = jax.random.split(key, 12)
    C = common_features

    def lin(k, fan_in, fan_out):
        bound = 1.0 / jnp.sqrt(jnp.float32(fan_in))
        return jax.random.uniform(
            k, (fan_in, fan_out), jnp.float32, minval=-bound, maxval=bound
        )

    def bias(k, fan_in, fan_out):
        bound = 1.0 / jnp.sqrt(jnp.float32(fan_in))
        return jax.random.uniform(
            k, (1, fan_out), jnp.float32, minval=-bound, maxval=bound
        )

    return {
        "Wb": lin(keys[0], branch_features, P),
        "W1": lin(keys[1], trunk_features, C), "b1": bias(keys[2], trunk_features, C),
        "W2": lin(keys[3], C, C),              "b2": bias(keys[4], C, C),
        "W3": lin(keys[5], C, C),              "b3": bias(keys[6], C, C),
        "W4": lin(keys[7], C, C),              "b4": bias(keys[8], C, C),
        "W5": lin(keys[9], C, P),              "b5": bias(keys[10], C, P),
        "w_last": jax.random.normal(keys[11], (1, P), jnp.float32),
    }


def prepare_params(params):
    """One-time constant folding of the P=1000 dimension (exact in real
    arithmetic; done once, outside the per-call path)."""
    scaled = params["Wb"] * params["w_last"]          # [bf, P]  fold w_last
    G = scaled @ params["W5"].T                       # [bf, C]
    c = scaled @ params["b5"].T                       # [bf, 1]
    Wmid = jnp.stack([params["W2"], params["W3"], params["W4"]], axis=0)  # [3,C,C]
    bmid = jnp.concatenate(
        [params["b1"], params["b2"], params["b3"], params["b4"]], axis=0
    )                                                 # [4, C]
    return {"G": G, "c": c, "W1": params["W1"], "Wmid": Wmid, "bmid": bmid}


def reference_forward(branch_input, trunk_input, params):
    """Pure-JAX reference with the original (non-collapsed) P-wide path."""
    branch = branch_input @ params["Wb"]
    h = jnp.tanh(trunk_input @ params["W1"] + params["b1"])
    h = jnp.tanh(h @ params["W2"] + params["b2"])
    h = jnp.tanh(h @ params["W3"] + params["b3"])
    h = jnp.tanh(h @ params["W4"] + params["b4"])
    trunk = h @ params["W5"] + params["b5"]
    return jnp.sum(branch * trunk * params["w_last"], axis=1, keepdims=True)


if __name__ == "__main__":
    # Small shapes consistent with the module:
    #   branch_input: [batch, branch_features]
    #   trunk_input : [batch, trunk_features]   (2D coordinates, Poisson 2D)
    batch = 600                 # not a tile multiple -> exercises padding
    branch_features = 16
    trunk_features = 2
    common_features = 32

    key = jax.random.PRNGKey(0)
    k_params, k_branch, k_trunk = jax.random.split(key, 3)

    params = init_params(k_params, branch_features, trunk_features, common_features)
    prepared = prepare_params(params)

    branch_input = jax.random.normal(k_branch, (batch, branch_features), jnp.float32)
    trunk_input = jax.random.normal(k_trunk, (batch, trunk_features), jnp.float32)

    # Small tile for the demo so the grid has several steps; use the default
    # (1024) or larger for real workloads.
    out = deeponet_forward(branch_input, trunk_input, prepared, block_b=256)
    out = jax.block_until_ready(out)

    ref = reference_forward(branch_input, trunk_input, params)
    assert out.shape == (batch, 1), out.shape
    # The algebraic collapse reorders f32 summation over P=1000 terms, so allow
    # a slightly looser tolerance than exact-bitwise parity.
    assert jnp.allclose(out, ref, rtol=1e-3, atol=1e-3), float(
        jnp.max(jnp.abs(out - ref))
    )

    print("KERNEL_OK")
</pallas_src>

<mosaic_0001>
module attributes {stable_mosaic.version = 11 : i64} {
  func.func @deeponet_kernel(%arg0: i32, %arg1: memref<256x16xf32, #tpu.memory_space<vmem>>, %arg2: memref<256x2xf32, #tpu.memory_space<vmem>>, %arg3: memref<16x32xf32, #tpu.memory_space<vmem>>, %arg4: memref<16x1xf32, #tpu.memory_space<vmem>>, %arg5: memref<2x32xf32, #tpu.memory_space<vmem>>, %arg6: memref<3x32x32xf32, #tpu.memory_space<vmem>>, %arg7: memref<4x32xf32, #tpu.memory_space<vmem>>, %arg8: memref<256x1xf32, #tpu.memory_space<vmem>>) attributes {dimension_semantics = [#tpu.dimension_semantics<parallel>], iteration_bounds = array<i64: 3>, scalar_prefetch = 0 : i64, scratch_operands = 0 : i64, tpu.core_type = #tpu.core_type<tc>, window_params = [{transform_indices = @transform_0, window_bounds = array<i64: 256, 16>}, {transform_indices = @transform_1, window_bounds = array<i64: 256, 2>}, {pipeline_mode = #tpu.pipeline_mode<synchronous>, transform_indices = @transform_2, window_bounds = array<i64: 16, 32>}, {pipeline_mode = #tpu.pipeline_mode<synchronous>, transform_indices = @transform_3, window_bounds = array<i64: 16, 1>}, {pipeline_mode = #tpu.pipeline_mode<synchronous>, transform_indices = @transform_4, window_bounds = array<i64: 2, 32>}, {pipeline_mode = #tpu.pipeline_mode<synchronous>, transform_indices = @transform_5, window_bounds = array<i64: 3, 32, 32>}, {pipeline_mode = #tpu.pipeline_mode<synchronous>, transform_indices = @transform_6, window_bounds = array<i64: 4, 32>}, {transform_indices = @transform_7, window_bounds = array<i64: 256, 1>}]} {
    %c0 = arith.constant 0 : index
    %c0_0 = arith.constant 0 : index
    %0 = vector.load %arg1[%c0, %c0_0] : memref<256x16xf32, #tpu.memory_space<vmem>>, vector<256x16xf32>
    %c0_1 = arith.constant 0 : index
    %c0_2 = arith.constant 0 : index
    %1 = vector.load %arg2[%c0_1, %c0_2] : memref<256x2xf32, #tpu.memory_space<vmem>>, vector<256x2xf32>
    %c0_3 = arith.constant 0 : index
    %c0_4 = arith.constant 0 : index
    %2 = vector.load %arg5[%c0_3, %c0_4] : memref<2x32xf32, #tpu.memory_space<vmem>>, vector<2x32xf32>
    %cst = arith.constant dense<0.000000e+00> : vector<256x32xf32>
    %3 = tpu.matmul %1, %2, %cst {dimension_numbers = #tpu.dot_dimension_numbers<[1], [0], [0], [1], [0, 0, 1, 1], [], []>} : vector<256x2xf32>, vector<2x32xf32>, vector<256x32xf32> -> vector<256x32xf32>
    %c0_5 = arith.constant 0 : index
    %c0_6 = arith.constant 0 : index
    %4 = vector.load %arg7[%c0_5, %c0_6] : memref<4x32xf32, #tpu.memory_space<vmem>>, vector<1x32xf32>
    %5 = vector.broadcast %4 : vector<1x32xf32> to vector<256x32xf32>
    %6 = arith.addf %3, %5 : vector<256x32xf32>
    %7 = math.tanh %6 : vector<256x32xf32>
    %c0_7 = arith.constant 0 : index
    %c0_8 = arith.constant 0 : index
    %c0_9 = arith.constant 0 : index
    %8 = vector.load %arg6[%c0_7, %c0_8, %c0_9] : memref<3x32x32xf32, #tpu.memory_space<vmem>>, vector<1x32x32xf32>
    %9 = vector.shape_cast %8 : vector<1x32x32xf32> to vector<32x32xf32>
    %cst_10 = arith.constant dense<0.000000e+00> : vector<256x32xf32>
    %10 = tpu.matmul %7, %9, %cst_10 {dimension_numbers = #tpu.dot_dimension_numbers<[1], [0], [0], [1], [0, 0, 1, 1], [], []>} : vector<256x32xf32>, vector<32x32xf32>, vector<256x32xf32> -> vector<256x32xf32>
    %c1 = arith.constant 1 : index
    %c0_11 = arith.constant 0 : index
    %11 = vector.load %arg7[%c1, %c0_11] : memref<4x32xf32, #tpu.memory_space<vmem>>, vector<1x32xf32>
    %12 = vector.broadcast %11 : vector<1x32xf32> to vector<256x32xf32>
    %13 = arith.addf %10, %12 : vector<256x32xf32>
    %14 = math.tanh %13 : vector<256x32xf32>
    %c1_12 = arith.constant 1 : index
    %c0_13 = arith.constant 0 : index
    %c0_14 = arith.constant 0 : index
    %15 = vector.load %arg6[%c1_12, %c0_13, %c0_14] : memref<3x32x32xf32, #tpu.memory_space<vmem>>, vector<1x32x32xf32>
    %16 = vector.shape_cast %15 : vector<1x32x32xf32> to vector<32x32xf32>
    %cst_15 = arith.constant dense<0.000000e+00> : vector<256x32xf32>
    %17 = tpu.matmul %14, %16, %cst_15 {dimension_numbers = #tpu.dot_dimension_numbers<[1], [0], [0], [1], [0, 0, 1, 1], [], []>} : vector<256x32xf32>, vector<32x32xf32>, vector<256x32xf32> -> vector<256x32xf32>
    %c2 = arith.constant 2 : index
    %c0_16 = arith.constant 0 : index
    %18 = vector.load %arg7[%c2, %c0_16] : memref<4x32xf32, #tpu.memory_space<vmem>>, vector<1x32xf32>
    %19 = vector.broadcast %18 : vector<1x32xf32> to vector<256x32xf32>
    %20 = arith.addf %17, %19 : vector<256x32xf32>
    %21 = math.tanh %20 : vector<256x32xf32>
    %c2_17 = arith.constant 2 : index
    %c0_18 = arith.constant 0 : index
    %c0_19 = arith.constant 0 : index
    %22 = vector.load %arg6[%c2_17, %c0_18, %c0_19] : memref<3x32x32xf32, #tpu.memory_space<vmem>>, vector<1x32x32xf32>
    %23 = vector.shape_cast %22 : vector<1x32x32xf32> to vector<32x32xf32>
    %cst_20 = arith.constant dense<0.000000e+00> : vector<256x32xf32>
    %24 = tpu.matmul %21, %23, %cst_20 {dimension_numbers = #tpu.dot_dimension_numbers<[1], [0], [0], [1], [0, 0, 1, 1], [], []>} : vector<256x32xf32>, vector<32x32xf32>, vector<256x32xf32> -> vector<256x32xf32>
    %c3 = arith.constant 3 : index
    %c0_21 = arith.constant 0 : index
    %25 = vector.load %arg7[%c3, %c0_21] : memref<4x32xf32, #tpu.memory_space<vmem>>, vector<1x32xf32>
    %26 = vector.broadcast %25 : vector<1x32xf32> to vector<256x32xf32>
    %27 = arith.addf %24, %26 : vector<256x32xf32>
    %28 = math.tanh %27 : vector<256x32xf32>
    %c0_22 = arith.constant 0 : index
    %c0_23 = arith.constant 0 : index
    %29 = vector.load %arg3[%c0_22, %c0_23] : memref<16x32xf32, #tpu.memory_space<vmem>>, vector<16x32xf32>
    %cst_24 = arith.constant dense<0.000000e+00> : vector<256x32xf32>
    %30 = tpu.matmul %0, %29, %cst_24 {dimension_numbers = #tpu.dot_dimension_numbers<[1], [0], [0], [1], [0, 0, 1, 1], [], []>} : vector<256x16xf32>, vector<16x32xf32>, vector<256x32xf32> -> vector<256x32xf32>
    %31 = arith.mulf %30, %28 : vector<256x32xf32>
    %cst_25 = arith.constant dense<0.000000e+00> : vector<256xf32>
    %32 = vector.multi_reduction <add>, %31, %cst_25 [1] : vector<256x32xf32> to vector<256xf32>
    %33 = vector.shape_cast %32 : vector<256xf32> to vector<256x1xf32>
    %c0_26 = arith.constant 0 : index
    %c0_27 = arith.constant 0 : index
    %34 = vector.load %arg4[%c0_26, %c0_27] : memref<16x1xf32, #tpu.memory_space<vmem>>, vector<16x1xf32>
    %cst_28 = arith.constant dense<0.000000e+00> : vector<256x1xf32>
    %35 = tpu.matmul %0, %34, %cst_28 {dimension_numbers = #tpu.dot_dimension_numbers<[1], [0], [0], [1], [0, 0, 1, 1], [], []>} : vector<256x16xf32>, vector<16x1xf32>, vector<256x1xf32> -> vector<256x1xf32>
    %36 = arith.addf %33, %35 : vector<256x1xf32>
    %c0_29 = arith.constant 0 : index
    %c0_30 = arith.constant 0 : index
    %37 = vector.load %arg8[%c0_29, %c0_30] : memref<256x1xf32, #tpu.memory_space<vmem>>, vector<256x1xf32>
    tpu.vector_store %arg8[%c0_29, %c0_30], %36 {strides = array<i32>} : memref<256x1xf32, #tpu.memory_space<vmem>>, vector<256x1xf32>,
    return
  }
  func.func @transform_0(%arg0: i32) -> (i32, i32) {
    %c0_i32 = arith.constant 0 : i32
    %c0_i32_0 = arith.constant 0 : i32
    return %arg0, %c0_i32 : i32, i32
  }
  func.func @transform_1(%arg0: i32) -> (i32, i32) {
    %c0_i32 = arith.constant 0 : i32
    %c0_i32_0 = arith.constant 0 : i32
    return %arg0, %c0_i32 : i32, i32
  }
  func.func @transform_2(%arg0: i32) -> (i32, i32) {
    %c0_i32 = arith.constant 0 : i32
    %c0_i32_0 = arith.constant 0 : i32
    %c0_i32_1 = arith.constant 0 : i32
    return %c0_i32, %c0_i32_0 : i32, i32
  }
  func.func @transform_3(%arg0: i32) -> (i32, i32) {
    %c0_i32 = arith.constant 0 : i32
    %c0_i32_0 = arith.constant 0 : i32
    %c0_i32_1 = arith.constant 0 : i32
    return %c0_i32, %c0_i32_0 : i32, i32
  }
  func.func @transform_4(%arg0: i32) -> (i32, i32) {
    %c0_i32 = arith.constant 0 : i32
    %c0_i32_0 = arith.constant 0 : i32
    %c0_i32_1 = arith.constant 0 : i32
    return %c0_i32, %c0_i32_0 : i32, i32
  }
  func.func @transform_5(%arg0: i32) -> (i32, i32, i32) {
    %c0_i32 = arith.constant 0 : i32
    %c0_i32_0 = arith.constant 0 : i32
    %c0_i32_1 = arith.constant 0 : i32
    %c0_i32_2 = arith.constant 0 : i32
    return %c0_i32, %c0_i32_0, %c0_i32_1 : i32, i32, i32
  }
  func.func @transform_6(%arg0: i32) -> (i32, i32) {
    %c0_i32 = arith.constant 0 : i32
    %c0_i32_0 = arith.constant 0 : i32
    %c0_i32_1 = arith.constant 0 : i32
    return %c0_i32, %c0_i32_0 : i32, i32
  }
  func.func @transform_7(%arg0: i32) -> (i32, i32) {
    %c0_i32 = arith.constant 0 : i32
    %c0_i32_0 = arith.constant 0 : i32
    return %arg0, %c0_i32 : i32, i32
  }
}

</mosaic_0001>

<bundles_post_ra>
// kernel: deeponet_forward.1
= control target key start
LH: loop header
LB: loop body
LE: loop exit
PB: predicated region body
PF: predicated region fallthrough
CT: control target
= control target key end

     0   :  { %s3726_s24 = smov 0   ;;  %s4589_s0 = inlined_call_operand.vmem [shape: f32[768,16], index: 0, kind: input, shape index: {}]   ;;  %s4590_s1 = inlined_call_operand.vmem [shape: f32[768,2], index: 1, kind: input, shape index: {}]   ;;  %s4591_s2 = inlined_call_operand.vmem [shape: f32[16,32], index: 2, kind: input, shape index: {}]   ;;  %s4592_s3 = inlined_call_operand.vmem [shape: f32[16,1], index: 3, kind: input, shape index: {}]   ;;  %s4593_s4 = inlined_call_operand.vmem [shape: f32[2,32], index: 4, kind: input, shape index: {}]   ;;  %s4594_s5 = inlined_call_operand.vmem [shape: f32[3,32,32], index: 5, kind: input, shape index: {}]   ;;  %s4595_s6 = inlined_call_operand.vmem [shape: f32[4,32], index: 6, kind: input, shape index: {}]   ;;  %s4596_s7 = inlined_call_operand.vmem [shape: f32[768,1], index: 7, kind: output, shape index: {}]  }
   0x1 LB: > { %s2633_s25 = sadd.s32 4294967295, %s3684_s24   ;;  %p2637_p0 = scmp.ge.s32.totalorder %s3684_s24, 1  ;;  %s3684_s24 = sphi %s3726_s24, %s17_s24  }
   0x2   : > { %p249_p1 = scmp.lt.s32.totalorder %s3684_s24, 4 }
   0x4   : > { %p250_p2 = pnand %p2637_p0, %p249_p1 }
   0x5   : > { %v368_v0 = vld [vmem:[%s4593_s4] sm:$0x3] (!%p250_p2)  ;;  %vm471_vm0 = vcmask (!%p250_p2), 1041408   ;;  %s2638_s28 = sshll.u32 (!%p250_p2), %s2633_s25, 5  ;;  %vm374_vm1 = vcmask (!%p250_p2), 15360   ;;  %v733_v34 = vld [vmem:[%s4594_s5 + $0x8] sm:$0xff] (!%p250_p2) }
   0x6   : > { %253 = sbr.rel (%p250_p2) target bundleno = 1136 (0x470), region = 48  ;;  %3060 = vmatprep.subr.msk.mxu0 (!%p250_p2), %vm471_vm0, %v368_v0  ;;  %p287_p3 = scmp.lt.s32.totalorder (!%p250_p2), %s2638_s28, 95  ;;  %v732_v33 = vld [vmem:[%s4594_s5] sm:$0xff] (!%p250_p2)  ;;  %v734_v36 = vld [vmem:[%s4594_s5 + $0x10] sm:$0xff] (!%p250_p2)  ;;  %v735_v37 = vld [vmem:[%s4594_s5 + $0x18] sm:$0xff] (!%p250_p2)  ;;  %vm741_vm2 = vcmask (!%p250_p2), 261120  }
   0x7   : > { %3061 = vmatpush3.msk.msra.mxu0 (!%p250_p2), %vm471_vm0, %v368_v0  ;;  %v3382_v35 = vpack.c.bf16 (!%p250_p2), %v733_v34, %v732_v33  ;;  %v3386_v38 = vpack.c.bf16 (!%p250_p2), %v735_v37, %v734_v36  ;;  %v2711_v39 = vld [vmem:[%s4594_s5 + $0x20] sm:$0xff] (!%p250_p2)  ;;  %v2712_v40 = vld [vmem:[%s4594_s5 + $0x28] sm:$0xff] (!%p250_p2)  ;;  %v2713_v41 = vld [vmem:[%s4594_s5 + $0x30] sm:$0xff] (!%p250_p2)  ;;  %vm1823_vm3 = vcmask (!%p250_p2), 130048   ;;  %vm2532_vm4 = vcmask (!%p250_p2), 7168  }
   0x8   : > { %v3390_v42 = vpack.c.bf16 (!%p250_p2), %v2712_v40, %v2711_v39  ;;  %v2714_v43 = vld [vmem:[%s4594_s5 + $0x38] sm:$0xff] (!%p250_p2)  ;;  %v3836_v45 = vld [vmem:[%s4595_s6] ss:$0 sm:$0xff] (!%p250_p2) }
   0x9   : > { %3383 = vmatprep.subr.bf16.mxu1 (!%p250_p2), %v3382_v35  ;;  %v3394_v44 = vpack.c.bf16 (!%p250_p2), %v2714_v43, %v2713_v41 }
   0xa   : > { %3385 = vmatpush3.bf16.msra.mxu1 (!%p250_p2), %v3382_v35  ;;  %3391 = vmatprep.subr.bf16.mxu0 (!%p250_p2), %v3390_v42 }
   0xb   : > { %3387 = vmatprep.subr.bf16.mxu1 (!%p250_p2), %v3386_v38 }
   0xd   : > { %s4598_s28 = smov (!%p287_p3, %s2638_s28), 95 }
   0xe   : > { %s3737_s29 = sshll.u32 %s4598_s28, 3  ;;  %3389 = vmatpush3.bf16.msra.mxu1 %v3386_v38 }
   0xf   : > { %s3743_s9 = scalar_lea.vmem %s4590_s1, %s3737_s29  ;;  %s3993_s23 = scalar_lea.vmem %s4589_s0, %s3737_s29 }
  0x10   : > { %v336_v1 = vld [vmem:[%s3743_s9] sm:$0xff]  ;;  %v337_v2 = vld [vmem:[%s3743_s9 + $0x8] sm:$0xff]  ;;  %v338_v3 = vld [vmem:[%s3743_s9 + $0x10] sm:$0xff]  ;;  %s4501_s13 = scalar_lea.vmem %s4596_s7, %s3737_s29 }
  0x11   : > { %3062 = vmatprep.mubr.msk.f32.mxu0 %vm374_vm1, %v336_v1  ;;  %v339_v4 = vld [vmem:[%s3743_s9 + $0x18] sm:$0xff]  ;;  %v340_v5 = vld [vmem:[%s3743_s9 + $0x20] sm:$0xff]  ;;  %v341_v6 = vld [vmem:[%s3743_s9 + $0x28] sm:$0xff] }
  0x12   : > { %3063 = vmatmul.mubr.msk.f32.vlgmr.msra.gmra.mrb[0].mxu0 %vm374_vm1, %v337_v2  ;;  %v342_v7 = vld [vmem:[%s3743_s9 + $0x30] sm:$0xff]  ;;  %v343_v8 = vld [vmem:[%s3743_s9 + $0x38] sm:$0xff]  ;;  %v344_v9 = vld [vmem:[%s3743_s9 + $0x40] sm:$0xff] }
  0x13   : > { %3065 = vmatprep.mubr.msk.f32.mxu0 %vm374_vm1, %v338_v3  ;;  %v345_v10 = vld [vmem:[%s3743_s9 + $0x48] sm:$0xff]  ;;  %v346_v11 = vld [vmem:[%s3743_s9 + $0x50] sm:$0xff]  ;;  %v347_v12 = vld [vmem:[%s3743_s9 + $0x58] sm:$0xff]  ;;  %3393 = vmatpush3.bf16.msra.mxu0 %v3390_v42 }
  0x14   : > { %v348_v13 = vld [vmem:[%s3743_s9 + $0x60] sm:$0xff]  ;;  %v349_v14 = vld [vmem:[%s3743_s9 + $0x68] sm:$0xff]  ;;  %v350_v15 = vld [vmem:[%s3743_s9 + $0x70] sm:$0xff]  ;;  %3395 = vmatprep.subr.bf16.mxu0 %v3394_v44 }
  0x15   : > { %v351_v16 = vld [vmem:[%s3743_s9 + $0x78] sm:$0xff]  ;;  %v352_v17 = vld [vmem:[%s3743_s9 + $0x80] sm:$0xff]  ;;  %v353_v18 = vld [vmem:[%s3743_s9 + $0x88] sm:$0xff] }
  0x16   : > { %3066 = vmatmul.mubr.msk.f32.gmra.mrb[2].mxu0 %vm374_vm1, %v339_v4  ;;  %v354_v19 = vld [vmem:[%s3743_s9 + $0x90] sm:$0xff]  ;;  %v355_v20 = vld [vmem:[%s3743_s9 + $0x98] sm:$0xff]  ;;  %v356_v21 = vld [vmem:[%s3743_s9 + $0xa0] sm:$0xff] }
  0x17   : > { %3068 = vmatprep.mubr.msk.f32.mxu0 %vm374_vm1, %v340_v5  ;;  %v357_v22 = vld [vmem:[%s3743_s9 + $0xa8] sm:$0xff]  ;;  %v358_v23 = vld [vmem:[%s3743_s9 + $0xb0] sm:$0xff]  ;;  %v359_v24 = vld [vmem:[%s3743_s9 + $0xb8] sm:$0xff]  ;;  %3397 = vmatpush3.bf16.msra.mxu0 %v3394_v44 }
  0x18   : > { %v360_v25 = vld [vmem:[%s3743_s9 + $0xc0] sm:$0xff]  ;;  %v361_v26 = vld [vmem:[%s3743_s9 + $0xc8] sm:$0xff]  ;;  %v362_v27 = vld [vmem:[%s3743_s9 + $0xd0] sm:$0xff] }
  0x19   : > { %v363_v28 = vld [vmem:[%s3743_s9 + $0xd8] sm:$0xff]  ;;  %v364_v29 = vld [vmem:[%s3743_s9 + $0xe0] sm:$0xff]  ;;  %v365_v30 = vld [vmem:[%s3743_s9 + $0xe8] sm:$0xff] }
  0x1a   : > { %3069 = vmatmul.mubr.msk.f32.gmra.mrb[4].mxu0 %vm374_vm1, %v341_v6  ;;  %v366_v31 = vld [vmem:[%s3743_s9 + $0xf0] sm:$0xff]  ;;  %v367_v32 = vld [vmem:[%s3743_s9 + $0xf8] sm:$0xff] }
  0x1b   : > { %3071 = vmatprep.mubr.msk.f32.mxu0 %vm374_vm1, %v342_v7 }
  0x1e   : > { %3072 = vmatmul.mubr.msk.f32.gmra.mrb[6].mxu0 %vm374_vm1, %v343_v8 }
  0x1f   : > { %3074 = vmatprep.mubr.msk.f32.mxu0 %vm374_vm1, %v344_v9 }
  0x22   : > { %3075 = vmatmul.mubr.msk.f32.gmra.mrb[8].mxu0 %vm374_vm1, %v345_v10 }
  0x23   : > { %3077 = vmatprep.mubr.msk.f32.mxu0 %vm374_vm1, %v346_v11 }
  0x26   : > { %3078 = vmatmul.mubr.msk.f32.gmra.mrb[10].mxu0 %vm374_vm1, %v347_v12 }
  0x27   : > { %3080 = vmatprep.mubr.msk.f32.mxu0 %vm374_vm1, %v348_v13 }
  0x2a   : > { %3081 = vmatmul.mubr.msk.f32.gmra.mrb[12].mxu0 %vm374_vm1, %v349_v14 }
  0x2b   : > { %3083 = vmatprep.mubr.msk.f32.mxu0 %vm374_vm1, %v350_v15 }
  0x2e   : > { %3084 = vmatmul.mubr.msk.f32.gmra.mrb[14].mxu0 %vm374_vm1, %v351_v16 }
  0x2f   : > { %3086 = vmatprep.mubr.msk.f32.mxu0 %vm374_vm1, %v352_v17 }
  0x32   : > { %3087 = vmatmul.mubr.msk.f32.gmra.mrb[16].mxu0 %vm374_vm1, %v353_v18 }
  0x33   : > { %3089 = vmatprep.mubr.msk.f32.mxu0 %vm374_vm1, %v354_v19 }
  0x36   : > { %3090 = vmatmul.mubr.msk.f32.gmra.mrb[18].mxu0 %vm374_vm1, %v355_v20 }
  0x37   : > { %3092 = vmatprep.mubr.msk.f32.mxu0 %vm374_vm1, %v356_v21 }
  0x3a   : > { %3093 = vmatmul.mubr.msk.f32.gmra.mrb[20].mxu0 %vm374_vm1, %v357_v22 }
  0x3b   : > { %3095 = vmatprep.mubr.msk.f32.mxu0 %vm374_vm1, %v358_v23 }
  0x3e   : > { %3096 = vmatmul.mubr.msk.f32.gmra.mrb[22].mxu0 %vm374_vm1, %v359_v24 }
  0x3f   : > { %3098 = vmatprep.mubr.msk.f32.mxu0 %vm374_vm1, %v360_v25 }
  0x42   : > { %3099 = vmatmul.mubr.msk.f32.gmra.mrb[24].mxu0 %vm374_vm1, %v361_v26 }
  0x43   : > { %3101 = vmatprep.mubr.msk.f32.mxu0 %vm374_vm1, %v362_v27 }
  0x46   : > { %3102 = vmatmul.mubr.msk.f32.gmra.mrb[26].mxu0 %vm374_vm1, %v363_v28 }
  0x47   : > { %3104 = vmatprep.mubr.msk.f32.mxu0 %vm374_vm1, %v364_v29 }
  0x4a   : > { %3105 = vmatmul.mubr.msk.f32.gmra.mrb[28].mxu0 %vm374_vm1, %v365_v30 }
  0x4b   : > { %3107 = vmatprep.mubr.msk.f32.mxu0 %vm374_vm1, %v366_v31 }
  0x4e   : > { %3108 = vmatmul.mubr.msk.f32.gmra.mrb[30].mxu0 %vm374_vm1, %v367_v32 }
  0xe5   : > { %v3064_v46 = vpop.f32.mrb[0].mxu0 }
  0xe6   : > { %v547_v47 = vadd.f32 %v3064_v46, %v3836_v45  ;;  %v541_v48 = vpop.f32.mrb[1].mxu0 }
  0xe7   : > { %v542_v49 = vadd.f32 %v3836_v45, %v541_v48 }
  0xe9   : > { %3422 = vtanh.f32 %v542_v49  ;;  %v3067_v50 = vpop.f32.mrb[2].mxu0 }
  0xea   : > { %3424 = vtanh.f32 %v547_v47  ;;  %v557_v51 = vadd.f32 %v3067_v50, %v3836_v45  ;;  %v551_v52 = vpop.f32.mrb[3].mxu0 }
  0xeb   : > { %v552_v53 = vadd.f32 %v3836_v45, %v551_v52 }
  0xed   : > { %3426 = vtanh.f32 %v552_v53  ;;  %v3070_v54 = vpop.f32.mrb[4].mxu0 }
  0xee   : > { %3428 = vtanh.f32 %v557_v51  ;;  %v567_v55 = vadd.f32 %v3070_v54, %v3836_v45  ;;  %v561_v56 = vpop.f32.mrb[5].mxu0 }
  0xef   : > { %v562_v57 = vadd.f32 %v3836_v45, %v561_v56 }
  0xf0   : > { %3430 = vtanh.f32 %v567_v55 }
  0xf1   : > { %3432 = vtanh.f32 %v562_v57  ;;  %v3073_v58 = vpop.f32.mrb[6].mxu0 }
  0xf2   : > { %v577_v59 = vadd.f32 %v3073_v58, %v3836_v45  ;;  %v571_v60 = vpop.f32.mrb[7].mxu0 }
  0xf3   : > { %v3423_v61 = vpop.eup %3422  ;;  %v572_v62 = vadd.f32 %v3836_v45, %v571_v60 }
  0xf4   : > { %v3425_v63 = vpop.eup %3424  ;;  %3434 = vtanh.f32 %v577_v59  ;;  %3118 = vmatprep.mubr.msk.f32.mxu1 %vm741_vm2, %v3423_v61 }
  0xf5   : > { %3436 = vtanh.f32 %v572_v62  ;;  %v3076_v0 = vpop.f32.mrb[8].mxu0  ;;  %3119 = vmatmul.mubr.msk.f32.vlgmr.msra.gmra.mrb[0].mxu1 %vm741_vm2, %v3425_v63 }
  0xf6   : > { %v587_v1 = vadd.f32 %v3076_v0, %v3836_v45  ;;  %v581_v2 = vpop.f32.mrb[9].mxu0 }
  0xf7   : > { %v3427_v3 = vpop.eup %3426  ;;  %v582_v4 = vadd.f32 %v3836_v45, %v581_v2 }
  0xf8   : > { %v3429_v5 = vpop.eup %3428  ;;  %3438 = vtanh.f32 %v587_v1  ;;  %3121 = vmatprep.mubr.msk.f32.mxu1 %vm741_vm2, %v3427_v3 }
  0xf9   : > { %3440 = vtanh.f32 %v582_v4  ;;  %v3079_v6 = vpop.f32.mrb[10].mxu0  ;;  %3122 = vmatmul.mubr.msk.f32.gmra.mrb[2].mxu1 %vm741_vm2, %v3429_v5 }
  0xfa   : > { %v3431_v7 = vpop.eup %3430  ;;  %v597_v8 = vadd.f32 %v3079_v6, %v3836_v45  ;;  %v591_v9 = vpop.f32.mrb[11].mxu0 }
  0xfb   : > { %v3433_v10 = vpop.eup %3432  ;;  %v592_v11 = vadd.f32 %v3836_v45, %v591_v9 }
  0xfc   : > { %3442 = vtanh.f32 %v597_v8  ;;  %3124 = vmatprep.mubr.msk.f32.mxu1 %vm741_vm2, %v3433_v10 }
  0xfd   : > { %3444 = vtanh.f32 %v592_v11  ;;  %v3082_v12 = vpop.f32.mrb[12].mxu0  ;;  %3125 = vmatmul.mubr.msk.f32.gmra.mrb[4].mxu1 %vm741_vm2, %v3431_v7 }
  0xfe   : > { %v3435_v13 = vpop.eup %3434  ;;  %v607_v14 = vadd.f32 %v3082_v12, %v3836_v45  ;;  %v601_v15 = vpop.f32.mrb[13].mxu0 }
  0xff   : > { %v3437_v16 = vpop.eup %3436  ;;  %v602_v17 = vadd.f32 %v3836_v45, %v601_v15  ;;  %v2749_v15 = vld [vmem:[%s4594_s5 + $0x48] sm:$0xff] }
 0x100   : > { %3446 = vtanh.f32 %v607_v14  ;;  %3127 = vmatprep.mubr.msk.f32.mxu1 %vm741_vm2, %v3437_v16  ;;  %v2748_v14 = vld [vmem:[%s4594_s5 + $0x40] sm:$0xff] }
 0x101   : > { %3448 = vtanh.f32 %v602_v17  ;;  %v3085_v18 = vpop.f32.mrb[14].mxu0  ;;  %3128 = vmatmul.mubr.msk.f32.gmra.mrb[6].mxu1 %vm741_vm2, %v3435_v13  ;;  %v1821_v16 = vld [vmem:[%s4591_s2] sm:$0xff]  ;;  %v3398_v17 = vpack.c.bf16 %v2749_v15, %v2748_v14 }
 0x102   : > { %v3439_v19 = vpop.eup %3438  ;;  %v617_v20 = vadd.f32 %v3085_v18, %v3836_v45  ;;  %v611_v21 = vpop.f32.mrb[15].mxu0  ;;  %v1822_v18 = vld [vmem:[%s4591_s2 + $0x8] sm:$0xff] }
 0x103   : > { %v3441_v22 = vpop.eup %3440  ;;  %v612_v23 = vadd.f32 %v3836_v45, %v611_v21  ;;  %v3406_v21 = vpack.c.bf16 %v1822_v18, %v1821_v16  ;;  %3399 = vmatprep.subr.bf16.mxu1 %v3398_v17 }
 0x104   : > { %3450 = vtanh.f32 %v617_v20  ;;  %3130 = vmatprep.mubr.msk.f32.mxu1 %vm741_vm2, %v3441_v22  ;;  %v2751_v20 = vld [vmem:[%s4594_s5 + $0x58] sm:$0xff]  ;;  %3401 = vmatpush3.bf16.msra.mxu1 %v3398_v17 }
 0x105   : > { %3452 = vtanh.f32 %v612_v23  ;;  %v3088_v24 = vpop.f32.mrb[16].mxu0  ;;  %3131 = vmatmul.mubr.msk.f32.gmra.mrb[8].mxu1 %vm741_vm2, %v3439_v19  ;;  %v2750_v19 = vld [vmem:[%s4594_s5 + $0x50] sm:$0xff]  ;;  %3407 = vmatprep.subr.bf16.mxu0 %v3406_v21  ;;  %v3923_v23 = vld [vmem:[%s4595_s6 + $0x1] ss:$0 sm:$0xff] }
 0x106   : > { %v3443_v25 = vpop.eup %3442  ;;  %v627_v26 = vadd.f32 %v3088_v24, %v3836_v45  ;;  %v621_v27 = vpop.f32.mrb[17].mxu0  ;;  %v3402_v22 = vpack.c.bf16 %v2751_v20, %v2750_v19 }
 0x107   : > { %v3445_v28 = vpop.eup %3444  ;;  %v622_v29 = vadd.f32 %v3836_v45, %v621_v27 }
 0x108   : > { %3454 = vtanh.f32 %v627_v26  ;;  %3133 = vmatprep.mubr.msk.f32.mxu1 %vm741_vm2, %v3445_v28  ;;  %3403 = vmatprep.subr.bf16.mxu1 %v3402_v22 }
 0x109   : > { %3456 = vtanh.f32 %v622_v29  ;;  %v3091_v30 = vpop.f32.mrb[18].mxu0  ;;  %3134 = vmatmul.mubr.msk.f32.gmra.mrb[10].mxu1 %vm741_vm2, %v3443_v25 }
 0x10a   : > { %v3447_v31 = vpop.eup %3446  ;;  %v637_v32 = vadd.f32 %v3091_v30, %v3836_v45  ;;  %v631_v33 = vpop.f32.mrb[19].mxu0  ;;  %3405 = vmatpush3.bf16.msra.mxu1 %v3402_v22 }
 0x10b   : > { %v3449_v34 = vpop.eup %3448  ;;  %v632_v35 = vadd.f32 %v3836_v45, %v631_v33 }
 0x10c   : > { %3458 = vtanh.f32 %v637_v32  ;;  %3136 = vmatprep.mubr.msk.f32.mxu1 %vm741_vm2, %v3449_v34 }
 0x10d   : > { %3460 = vtanh.f32 %v632_v35  ;;  %v3094_v36 = vpop.f32.mrb[20].mxu0  ;;  %3137 = vmatmul.mubr.msk.f32.gmra.mrb[12].mxu1 %vm741_vm2, %v3447_v31 }
 0x10e   : > { %v3451_v37 = vpop.eup %3450  ;;  %v647_v38 = vadd.f32 %v3094_v36, %v3836_v45  ;;  %v641_v39 = vpop.f32.mrb[21].mxu0 }
 0x10f   : > { %v3453_v40 = vpop.eup %3452  ;;  %v642_v41 = vadd.f32 %v3836_v45, %v641_v39 }
 0x110   : > { %3462 = vtanh.f32 %v647_v38  ;;  %3139 = vmatprep.mubr.msk.f32.mxu1 %vm741_vm2, %v3453_v40 }
 0x111   : > { %3464 = vtanh.f32 %v642_v41  ;;  %v3097_v42 = vpop.f32.mrb[22].mxu0  ;;  %3140 = vmatmul.mubr.msk.f32.gmra.mrb[14].mxu1 %vm741_vm2, %v3451_v37 }
 0x112   : > { %v3455_v43 = vpop.eup %3454  ;;  %v657_v44 = vadd.f32 %v3097_v42, %v3836_v45  ;;  %v651_v46 = vpop.f32.mrb[23].mxu0 }
 0x113   : > { %v3457_v47 = vpop.eup %3456  ;;  %v652_v48 = vadd.f32 %v3836_v45, %v651_v46 }
 0x114   : > { %3466 = vtanh.f32 %v657_v44  ;;  %3142 = vmatprep.mubr.msk.f32.mxu1 %vm741_vm2, %v3457_v47 }
 0x115   : > { %3468 = vtanh.f32 %v652_v48  ;;  %v3100_v49 = vpop.f32.mrb[24].mxu0  ;;  %3143 = vmatmul.mubr.msk.f32.gmra.mrb[16].mxu1 %vm741_vm2, %v3455_v43 }
 0x116   : > { %v3459_v50 = vpop.eup %3458  ;;  %v667_v51 = vadd.f32 %v3100_v49, %v3836_v45  ;;  %v661_v52 = vpop.f32.mrb[25].mxu0 }
 0x117   : > { %v3461_v53 = vpop.eup %3460  ;;  %v662_v54 = vadd.f32 %v3836_v45, %v661_v52 }
 0x118   : > { %3470 = vtanh.f32 %v667_v51  ;;  %3145 = vmatprep.mubr.msk.f32.mxu1 %vm741_vm2, %v3461_v53 }
 0x119   : > { %3472 = vtanh.f32 %v662_v54  ;;  %v3103_v55 = vpop.f32.mrb[26].mxu0  ;;  %3146 = vmatmul.mubr.msk.f32.gmra.mrb[18].mxu1 %vm741_vm2, %v3459_v50 }
 0x11a   : > { %v3463_v56 = vpop.eup %3462  ;;  %v677_v57 = vadd.f32 %v3103_v55, %v3836_v45  ;;  %v671_v58 = vpop.f32.mrb[27].mxu0 }
 0x11b   : > { %v3465_v59 = vpop.eup %3464  ;;  %v672_v60 = vadd.f32 %v3836_v45, %v671_v58 }
 0x11c   : > { %3474 = vtanh.f32 %v677_v57  ;;  %3148 = vmatprep.mubr.msk.f32.mxu1 %vm741_vm2, %v3465_v59 }
 0x11d   : > { %3476 = vtanh.f32 %v672_v60  ;;  %v3106_v61 = vpop.f32.mrb[28].mxu0  ;;  %3149 = vmatmul.mubr.msk.f32.gmra.mrb[20].mxu1 %vm741_vm2, %v3463_v56 }
 0x11e   : > { %v3467_v62 = vpop.eup %3466  ;;  %v687_v63 = vadd.f32 %v3106_v61, %v3836_v45  ;;  %v681_v0 = vpop.f32.mrb[29].mxu0 }
 0x11f   : > { %v3469_v1 = vpop.eup %3468  ;;  %v682_v2 = vadd.f32 %v3836_v45, %v681_v0 }
 0x120   : > { %3478 = vtanh.f32 %v687_v63  ;;  %3151 = vmatprep.mubr.msk.f32.mxu1 %vm741_vm2, %v3469_v1 }
 0x121   : > { %3480 = vtanh.f32 %v682_v2  ;;  %v3109_v3 = vpop.f32.mrb[30].mxu0  ;;  %3152 = vmatmul.mubr.msk.f32.gmra.mrb[22].mxu1 %vm741_vm2, %v3467_v62 }
 0x122   : > { %v3471_v4 = vpop.eup %3470  ;;  %v697_v5 = vadd.f32 %v3109_v3, %v3836_v45  ;;  %v691_v6 = vpop.f32.mrb[31].mxu0 }
 0x123   : > { %v3473_v7 = vpop.eup %3472  ;;  %v692_v8 = vadd.f32 %v3836_v45, %v691_v6 }
 0x124   : > { %3482 = vtanh.f32 %v697_v5  ;;  %3154 = vmatprep.mubr.msk.f32.mxu1 %vm741_vm2, %v3473_v7 }
 0x125   : > { %3484 = vtanh.f32 %v692_v8  ;;  %3155 = vmatmul.mubr.msk.f32.gmra.mrb[24].mxu1 %vm741_vm2, %v3471_v4 }
 0x126   : > { %v3475_v9 = vpop.eup %3474 }
 0x127   : > { %v3477_v10 = vpop.eup %3476 }
 0x128   : > { %3157 = vmatprep.mubr.msk.f32.mxu1 %vm741_vm2, %v3477_v10 }
 0x129   : > { %3158 = vmatmul.mubr.msk.f32.gmra.mrb[26].mxu1 %vm741_vm2, %v3475_v9 }
 0x12a   : > { %v3479_v11 = vpop.eup %3478 }
 0x12b   : > { %v3481_v12 = vpop.eup %3480 }
 0x12c   : > { %3160 = vmatprep.mubr.msk.f32.mxu1 %vm741_vm2, %v3481_v12 }
 0x12d   : > { %3161 = vmatmul.mubr.msk.f32.gmra.mrb[28].mxu1 %vm741_vm2, %v3479_v11 }
 0x12e   : > { %v3483_v13 = vpop.eup %3482 }
 0x12f   : > { %v3485_v45 = vpop.eup %3484 }
 0x130   : > { %3163 = vmatprep.mubr.msk.f32.mxu1 %vm741_vm2, %v3485_v45 }
 0x131   : > { %3164 = vmatmul.mubr.msk.f32.gmra.mrb[30].mxu1 %vm741_vm2, %v3483_v13 }
 0x1c8   : > { %v3120_v24 = vpop.f32.mrb[0].mxu1 }
 0x1c9   : > { %v910_v25 = vadd.f32 %v3120_v24, %v3923_v23  ;;  %v904_v26 = vpop.f32.mrb[1].mxu1 }
 0x1ca   : > { %v905_v27 = vadd.f32 %v3923_v23, %v904_v26 }
 0x1cc   : > { %3486 = vtanh.f32 %v905_v27  ;;  %v3123_v28 = vpop.f32.mrb[2].mxu1 }
 0x1cd   : > { %3488 = vtanh.f32 %v910_v25  ;;  %v920_v29 = vadd.f32 %v3123_v28, %v3923_v23  ;;  %v914_v30 = vpop.f32.mrb[3].mxu1 }
 0x1ce   : > { %v915_v31 = vadd.f32 %v3923_v23, %v914_v30 }
 0x1d0   : > { %3490 = vtanh.f32 %v915_v31  ;;  %v3126_v32 = vpop.f32.mrb[4].mxu1 }
 0x1d1   : > { %3492 = vtanh.f32 %v920_v29  ;;  %v930_v33 = vadd.f32 %v3126_v32, %v3923_v23  ;;  %v924_v34 = vpop.f32.mrb[5].mxu1 }
 0x1d2   : > { %v925_v35 = vadd.f32 %v3923_v23, %v924_v34 }
 0x1d3   : > { %3494 = vtanh.f32 %v930_v33 }
 0x1d4   : > { %3496 = vtanh.f32 %v925_v35  ;;  %v3129_v36 = vpop.f32.mrb[6].mxu1 }
 0x1d5   : > { %v940_v37 = vadd.f32 %v3129_v36, %v3923_v23  ;;  %v934_v38 = vpop.f32.mrb[7].mxu1 }
 0x1d6   : > { %v3487_v39 = vpop.eup %3486  ;;  %v935_v40 = vadd.f32 %v3923_v23, %v934_v38 }
 0x1d7   : > { %v3489_v41 = vpop.eup %3488  ;;  %3498 = vtanh.f32 %v940_v37  ;;  %3174 = vmatprep.mubr.msk.f32.mxu0 %vm741_vm2, %v3487_v39 }
 0x1d8   : > { %3500 = vtanh.f32 %v935_v40  ;;  %v3132_v42 = vpop.f32.mrb[8].mxu1  ;;  %3175 = vmatmul.mubr.msk.f32.vlgmr.msra.gmra.mrb[32].mxu0 %vm741_vm2, %v3489_v41 }
 0x1d9   : > { %v950_v43 = vadd.f32 %v3132_v42, %v3923_v23  ;;  %v944_v44 = vpop.f32.mrb[9].mxu1  ;;  %3409 = vmatpush3.bf16.msra.mxu0 %v3406_v21 }
 0x1da   : > { %v3491_v46 = vpop.eup %3490  ;;  %v945_v47 = vadd.f32 %v3923_v23, %v944_v44 }
 0x1db   : > { %v3493_v48 = vpop.eup %3492  ;;  %3502 = vtanh.f32 %v950_v43  ;;  %3177 = vmatprep.mubr.msk.f32.mxu0 %vm741_vm2, %v3491_v46 }
 0x1dc   : > { %3504 = vtanh.f32 %v945_v47  ;;  %v3135_v49 = vpop.f32.mrb[10].mxu1  ;;  %3178 = vmatmul.mubr.msk.f32.gmra.mrb[34].mxu0 %vm741_vm2, %v3493_v48 }
 0x1dd   : > { %v3495_v50 = vpop.eup %3494  ;;  %v960_v51 = vadd.f32 %v3135_v49, %v3923_v23  ;;  %v954_v52 = vpop.f32.mrb[11].mxu1 }
 0x1de   : > { %v3497_v53 = vpop.eup %3496  ;;  %v955_v54 = vadd.f32 %v3923_v23, %v954_v52 }
 0x1df   : > { %3506 = vtanh.f32 %v960_v51  ;;  %3180 = vmatprep.mubr.msk.f32.mxu0 %vm741_vm2, %v3497_v53 }
 0x1e0   : > { %3508 = vtanh.f32 %v955_v54  ;;  %v3138_v55 = vpop.f32.mrb[12].mxu1  ;;  %3181 = vmatmul.mubr.msk.f32.gmra.mrb[36].mxu0 %vm741_vm2, %v3495_v50 }
 0x1e1   : > { %v3499_v56 = vpop.eup %3498  ;;  %v970_v57 = vadd.f32 %v3138_v55, %v3923_v23  ;;  %v964_v58 = vpop.f32.mrb[13].mxu1 }
 0x1e2   : > { %v3501_v59 = vpop.eup %3500  ;;  %v965_v60 = vadd.f32 %v3923_v23, %v964_v58  ;;  %v4001_v58 = vld [vmem:[%s3993_s23 + $0x8] sm:$0xff] }
 0x1e3   : > { %3510 = vtanh.f32 %v970_v57  ;;  %3183 = vmatprep.mubr.msk.f32.mxu0 %vm741_vm2, %v3501_v59  ;;  %v3996_v57 = vld [vmem:[%s3993_s23] sm:$0xff]  ;;  %v4006_v59 = vld [vmem:[%s3993_s23 + $0x10] sm:$0xff] }
 0x1e4   : > { %3512 = vtanh.f32 %v965_v60  ;;  %v3141_v61 = vpop.f32.mrb[14].mxu1  ;;  %3184 = vmatmul.mubr.msk.f32.gmra.mrb[38].mxu0 %vm741_vm2, %v3499_v56  ;;  %v4011_v60 = vld [vmem:[%s3993_s23 + $0x18] sm:$0xff] }
 0x1e5   : > { %v3503_v62 = vpop.eup %3502  ;;  %v980_v63 = vadd.f32 %v3141_v61, %v3923_v23  ;;  %v974_v0 = vpop.f32.mrb[15].mxu1  ;;  %v4016_v61 = vld [vmem:[%s3993_s23 + $0x20] sm:$0xff] }
 0x1e6   : > { %v3505_v1 = vpop.eup %3504  ;;  %v975_v2 = vadd.f32 %v3923_v23, %v974_v0  ;;  %v4031_v0 = vld [vmem:[%s3993_s23 + $0x38] sm:$0xff] }
 0x1e7   : > { %3514 = vtanh.f32 %v980_v63  ;;  %3186 = vmatprep.mubr.msk.f32.mxu0 %vm741_vm2, %v3505_v1  ;;  %v4026_v63 = vld [vmem:[%s3993_s23 + $0x30] sm:$0xff]  ;;  %v4036_v1 = vld [vmem:[%s3993_s23 + $0x40] sm:$0xff] }
 0x1e8   : > { %3516 = vtanh.f32 %v975_v2  ;;  %v3144_v3 = vpop.f32.mrb[16].mxu1  ;;  %3187 = vmatmul.mubr.msk.f32.gmra.mrb[40].mxu0 %vm741_vm2, %v3503_v62  ;;  %v4021_v62 = vld [vmem:[%s3993_s23 + $0x28] sm:$0xff] }
 0x1e9   : > { %v3507_v4 = vpop.eup %3506  ;;  %v990_v5 = vadd.f32 %v3144_v3, %v3923_v23  ;;  %v984_v6 = vpop.f32.mrb[17].mxu1  ;;  %v4041_v2 = vld [vmem:[%s3993_s23 + $0x48] sm:$0xff]  ;;  %v4046_v3 = vld [vmem:[%s3993_s23 + $0x50] sm:$0xff] }
 0x1ea   : > { %v3509_v7 = vpop.eup %3508  ;;  %v985_v8 = vadd.f32 %v3923_v23, %v984_v6  ;;  %v4061_v6 = vld [vmem:[%s3993_s23 + $0x68] sm:$0xff] }
 0x1eb   : > { %3518 = vtanh.f32 %v990_v5  ;;  %3189 = vmatprep.mubr.msk.f32.mxu0 %vm741_vm2, %v3509_v7  ;;  %v4056_v5 = vld [vmem:[%s3993_s23 + $0x60] sm:$0xff]  ;;  %v4066_v7 = vld [vmem:[%s3993_s23 + $0x70] sm:$0xff] }
 0x1ec   : > { %3520 = vtanh.f32 %v985_v8  ;;  %v3147_v9 = vpop.f32.mrb[18].mxu1  ;;  %3190 = vmatmul.mubr.msk.f32.gmra.mrb[42].mxu0 %vm741_vm2, %v3507_v4  ;;  %v4051_v4 = vld [vmem:[%s3993_s23 + $0x58] sm:$0xff] }
 0x1ed   : > { %v3511_v10 = vpop.eup %3510  ;;  %v1000_v11 = vadd.f32 %v3147_v9, %v3923_v23  ;;  %v994_v12 = vpop.f32.mrb[19].mxu1  ;;  %v4071_v8 = vld [vmem:[%s3993_s23 + $0x78] sm:$0xff]  ;;  %v4076_v9 = vld [vmem:[%s3993_s23 + $0x80] sm:$0xff] }
 0x1ee   : > { %v3513_v13 = vpop.eup %3512  ;;  %v995_v45 = vadd.f32 %v3923_v23, %v994_v12  ;;  %v4091_v12 = vld [vmem:[%s3993_s23 + $0x98] sm:$0xff] }
 0x1ef   : > { %3522 = vtanh.f32 %v1000_v11  ;;  %3192 = vmatprep.mubr.msk.f32.mxu0 %vm741_vm2, %v3513_v13  ;;  %v4086_v11 = vld [vmem:[%s3993_s23 + $0x90] sm:$0xff]  ;;  %v4096_v13 = vld [vmem:[%s3993_s23 + $0xa0] sm:$0xff] }
 0x1f0   : > { %3524 = vtanh.f32 %v995_v45  ;;  %v3150_v14 = vpop.f32.mrb[20].mxu1  ;;  %3193 = vmatmul.mubr.msk.f32.gmra.mrb[44].mxu0 %vm741_vm2, %v3511_v10  ;;  %v4081_v10 = vld [vmem:[%s3993_s23 + $0x88] sm:$0xff] }
 0x1f1   : > { %v3515_v15 = vpop.eup %3514  ;;  %v1010_v16 = vadd.f32 %v3150_v14, %v3923_v23  ;;  %v1004_v17 = vpop.f32.mrb[21].mxu1  ;;  %v4101_v45 = vld [vmem:[%s3993_s23 + $0xa8] sm:$0xff]  ;;  %v4106_v14 = vld [vmem:[%s3993_s23 + $0xb0] sm:$0xff] }
 0x1f2   : > { %v3517_v18 = vpop.eup %3516  ;;  %v1005_v19 = vadd.f32 %v3923_v23, %v1004_v17  ;;  %v4121_v17 = vld [vmem:[%s3993_s23 + $0xc8] sm:$0xff] }
 0x1f3   : > { %3526 = vtanh.f32 %v1010_v16  ;;  %3195 = vmatprep.mubr.msk.f32.mxu0 %vm741_vm2, %v3517_v18  ;;  %v4116_v16 = vld [vmem:[%s3993_s23 + $0xc0] sm:$0xff]  ;;  %v4124_v18 = vld [vmem:[%s3993_s23 + $0xd0] sm:$0xff] }
 0x1f4   : > { %3528 = vtanh.f32 %v1005_v19  ;;  %v3153_v20 = vpop.f32.mrb[22].mxu1  ;;  %3196 = vmatmul.mubr.msk.f32.gmra.mrb[46].mxu0 %vm741_vm2, %v3515_v15  ;;  %v4111_v15 = vld [vmem:[%s3993_s23 + $0xb8] sm:$0xff] }
 0x1f5   : > { %v3519_v21 = vpop.eup %3518  ;;  %v1020_v22 = vadd.f32 %v3153_v20, %v3923_v23  ;;  %v1014_v24 = vpop.f32.mrb[23].mxu1  ;;  %v4131_v19 = vld [vmem:[%s3993_s23 + $0xd8] sm:$0xff]  ;;  %v2273_v20 = vld [vmem:[%s4592_s3] sm:$0xff] }
 0x1f6   : > { %v3521_v25 = vpop.eup %3520  ;;  %v1015_v26 = vadd.f32 %v3923_v23, %v1014_v24 }
 0x1f7   : > { %3530 = vtanh.f32 %v1020_v22  ;;  %3198 = vmatprep.mubr.msk.f32.mxu0 %vm741_vm2, %v3521_v25  ;;  %v4140_v22 = vld [vmem:[%s3993_s23 + $0xe0] sm:$0xff]  ;;  %v4147_v25 = vld [vmem:[%s3993_s23 + $0xe8] sm:$0xff] }
 0x1f8   : > { %3532 = vtanh.f32 %v1015_v26  ;;  %v3156_v27 = vpop.f32.mrb[24].mxu1  ;;  %3199 = vmatmul.mubr.msk.f32.gmra.mrb[48].mxu0 %vm741_vm2, %v3519_v21  ;;  %v2274_v21 = vld [vmem:[%s4592_s3 + $0x8] sm:$0xff]  ;;  %v4150_v26 = vld [vmem:[%s3993_s23 + $0xf0] sm:$0xff] }
 0x1f9   : > { %v3523_v28 = vpop.eup %3522  ;;  %v1030_v29 = vadd.f32 %v3156_v27, %v3923_v23  ;;  %v1024_v30 = vpop.f32.mrb[25].mxu1  ;;  %v3410_v24 = vpack.c.bf16 %v2274_v21, %v2273_v20  ;;  %v4157_v27 = vld [vmem:[%s3993_s23 + $0xf8] sm:$0xff] }
 0x1fa   : > { %v3525_v31 = vpop.eup %3524  ;;  %v1025_v32 = vadd.f32 %v3923_v23, %v1024_v30 }
 0x1fb   : > { %3534 = vtanh.f32 %v1030_v29  ;;  %3201 = vmatprep.mubr.msk.f32.mxu0 %vm741_vm2, %v3525_v31  ;;  %3411 = vmatprep.subr.bf16.mxu1 %v3410_v24 }
 0x1fc   : > { %3536 = vtanh.f32 %v1025_v32  ;;  %v3159_v33 = vpop.f32.mrb[26].mxu1  ;;  %3202 = vmatmul.mubr.msk.f32.gmra.mrb[50].mxu0 %vm741_vm2, %v3523_v28  ;;  %v4164_v28 = vld [vmem:[%s4595_s6 + $0x2] ss:$0 sm:$0xff] }
 0x1fd   : > { %v3527_v34 = vpop.eup %3526  ;;  %v1040_v35 = vadd.f32 %v3159_v33, %v3923_v23  ;;  %v1034_v36 = vpop.f32.mrb[27].mxu1 }
 0x1fe   : > { %v3529_v37 = vpop.eup %3528  ;;  %v1035_v38 = vadd.f32 %v3923_v23, %v1034_v36 }
 0x1ff   : > { %3538 = vtanh.f32 %v1040_v35  ;;  %3204 = vmatprep.mubr.msk.f32.mxu0 %vm741_vm2, %v3529_v37 }
 0x200   : > { %3540 = vtanh.f32 %v1035_v38  ;;  %v3162_v39 = vpop.f32.mrb[28].mxu1  ;;  %3205 = vmatmul.mubr.msk.f32.gmra.mrb[52].mxu0 %vm741_vm2, %v3527_v34 }
 0x201   : > { %v3531_v40 = vpop.eup %3530  ;;  %v1050_v41 = vadd.f32 %v3162_v39, %v3923_v23  ;;  %v1044_v42 = vpop.f32.mrb[29].mxu1 }
 0x202   : > { %v3533_v43 = vpop.eup %3532  ;;  %v1045_v44 = vadd.f32 %v3923_v23, %v1044_v42 }
 0x203   : > { %3542 = vtanh.f32 %v1050_v41  ;;  %3207 = vmatprep.mubr.msk.f32.mxu0 %vm741_vm2, %v3533_v43 }
 0x204   : > { %3544 = vtanh.f32 %v1045_v44  ;;  %v3165_v46 = vpop.f32.mrb[30].mxu1  ;;  %3208 = vmatmul.mubr.msk.f32.gmra.mrb[54].mxu0 %vm741_vm2, %v3531_v40 }
 0x205   : > { %v3535_v47 = vpop.eup %3534  ;;  %v1060_v48 = vadd.f32 %v3165_v46, %v3923_v23  ;;  %v1054_v49 = vpop.f32.mrb[31].mxu1 }
 0x206   : > { %v3537_v50 = vpop.eup %3536  ;;  %v1055_v51 = vadd.f32 %v3923_v23, %v1054_v49 }
 0x207   : > { %3546 = vtanh.f32 %v1060_v48  ;;  %3210 = vmatprep.mubr.msk.f32.mxu0 %vm741_vm2, %v3537_v50 }
 0x208   : > { %3548 = vtanh.f32 %v1055_v51  ;;  %3211 = vmatmul.mubr.msk.f32.gmra.mrb[56].mxu0 %vm741_vm2, %v3535_v47 }
 0x209   : > { %v3539_v52 = vpop.eup %3538 }
 0x20a   : > { %v3541_v53 = vpop.eup %3540 }
 0x20b   : > { %3213 = vmatprep.mubr.msk.f32.mxu0 %vm741_vm2, %v3541_v53 }
 0x20c   : > { %3214 = vmatmul.mubr.msk.f32.gmra.mrb[58].mxu0 %vm741_vm2, %v3539_v52 }
 0x20d   : > { %v3543_v54 = vpop.eup %3542 }
 0x20e   : > { %v3545_v55 = vpop.eup %3544 }
 0x20f   : > { %3216 = vmatprep.mubr.msk.f32.mxu0 %vm741_vm2, %v3545_v55 }
 0x210   : > { %3217 = vmatmul.mubr.msk.f32.gmra.mrb[60].mxu0 %vm741_vm2, %v3543_v54 }
 0x211   : > { %v3547_v23 = vpop.eup %3546 }
 0x212   : > { %v3549_v56 = vpop.eup %3548 }
 0x213   : > { %3219 = vmatprep.mubr.msk.f32.mxu0 %vm741_vm2, %v3549_v56 }
 0x214   : > { %3220 = vmatmul.mubr.msk.f32.gmra.mrb[62].mxu0 %vm741_vm2, %v3547_v23 }
 0x215   : > { %3282 = vmatprep.mubr.msk.f32.mxu0 %vm1823_vm3, %v3996_v57 }
 0x218   : > { %3283 = vmatmul.mubr.msk.f32.vlgmr.msra.gmra.mrb[64].mxu0 %vm1823_vm3, %v4001_v58 }
 0x219   : > { %3285 = vmatprep.mubr.msk.f32.mxu0 %vm1823_vm3, %v4006_v59 }
 0x21c   : > { %3286 = vmatmul.mubr.msk.f32.gmra.mrb[66].mxu0 %vm1823_vm3, %v4011_v60 }
 0x21d   : > { %3288 = vmatprep.mubr.msk.f32.mxu0 %vm1823_vm3, %v4016_v61 }
 0x220   : > { %3289 = vmatmul.mubr.msk.f32.gmra.mrb[68].mxu0 %vm1823_vm3, %v4021_v62 }
 0x221   : > { %3291 = vmatprep.mubr.msk.f32.mxu0 %vm1823_vm3, %v4026_v63 }
 0x224   : > { %3292 = vmatmul.mubr.msk.f32.gmra.mrb[70].mxu0 %vm1823_vm3, %v4031_v0 }
 0x225   : > { %3294 = vmatprep.mubr.msk.f32.mxu0 %vm1823_vm3, %v4036_v1 }
 0x228   : > { %3295 = vmatmul.mubr.msk.f32.gmra.mrb[72].mxu0 %vm1823_vm3, %v4041_v2 }
 0x229   : > { %3297 = vmatprep.mubr.msk.f32.mxu0 %vm1823_vm3, %v4046_v3 }
 0x22c   : > { %3298 = vmatmul.mubr.msk.f32.gmra.mrb[74].mxu0 %vm1823_vm3, %v4051_v4 }
 0x22d   : > { %3300 = vmatprep.mubr.msk.f32.mxu0 %vm1823_vm3, %v4056_v5 }
 0x230   : > { %3301 = vmatmul.mubr.msk.f32.gmra.mrb[76].mxu0 %vm1823_vm3, %v4061_v6 }
 0x231   : > { %3303 = vmatprep.mubr.msk.f32.mxu0 %vm1823_vm3, %v4066_v7 }
 0x234   : > { %3304 = vmatmul.mubr.msk.f32.gmra.mrb[78].mxu0 %vm1823_vm3, %v4071_v8 }
 0x235   : > { %3306 = vmatprep.mubr.msk.f32.mxu0 %vm1823_vm3, %v4076_v9 }
 0x238   : > { %3307 = vmatmul.mubr.msk.f32.gmra.mrb[80].mxu0 %vm1823_vm3, %v4081_v10 }
 0x239   : > { %3309 = vmatprep.mubr.msk.f32.mxu0 %vm1823_vm3, %v4086_v11 }
 0x23c   : > { %3310 = vmatmul.mubr.msk.f32.gmra.mrb[82].mxu0 %vm1823_vm3, %v4091_v12 }
 0x23d   : > { %3312 = vmatprep.mubr.msk.f32.mxu0 %vm1823_vm3, %v4096_v13 }
 0x240   : > { %3313 = vmatmul.mubr.msk.f32.gmra.mrb[84].mxu0 %vm1823_vm3, %v4101_v45 }
 0x241   : > { %3315 = vmatprep.mubr.msk.f32.mxu0 %vm1823_vm3, %v4106_v14 }
 0x244   : > { %3316 = vmatmul.mubr.msk.f32.gmra.mrb[86].mxu0 %vm1823_vm3, %v4111_v15 }
 0x245   : > { %3318 = vmatprep.mubr.msk.f32.mxu0 %vm1823_vm3, %v4116_v16 }
 0x248   : > { %3319 = vmatmul.mubr.msk.f32.gmra.mrb[88].mxu0 %vm1823_vm3, %v4121_v17 }
 0x249   : > { %3321 = vmatprep.mubr.msk.f32.mxu0 %vm1823_vm3, %v4124_v18 }
 0x24c   : > { %3322 = vmatmul.mubr.msk.f32.gmra.mrb[90].mxu0 %vm1823_vm3, %v4131_v19 }
 0x24d   : > { %3324 = vmatprep.mubr.msk.f32.mxu0 %vm1823_vm3, %v4140_v22 }
 0x250   : > { %3325 = vmatmul.mubr.msk.f32.gmra.mrb[92].mxu0 %vm1823_vm3, %v4147_v25 }
 0x251   : > { %3327 = vmatprep.mubr.msk.f32.mxu0 %vm1823_vm3, %v4150_v26 }
 0x254   : > { %3328 = vmatmul.mubr.msk.f32.gmra.mrb[94].mxu0 %vm1823_vm3, %v4157_v27 }
 0x2ab   : > { %v3176_v29 = vpop.f32.mrb[32].mxu0 }
 0x2ac   : > { %v1273_v30 = vadd.f32 %v3176_v29, %v4164_v28  ;;  %v1267_v31 = vpop.f32.mrb[33].mxu0 }
 0x2ad   : > { %v1268_v32 = vadd.f32 %v4164_v28, %v1267_v31 }
 0x2af   : > { %3550 = vtanh.f32 %v1268_v32  ;;  %v3179_v33 = vpop.f32.mrb[34].mxu0 }
 0x2b0   : > { %3552 = vtanh.f32 %v1273_v30  ;;  %v1283_v34 = vadd.f32 %v3179_v33, %v4164_v28  ;;  %v1277_v35 = vpop.f32.mrb[35].mxu0 }
 0x2b1   : > { %v1278_v36 = vadd.f32 %v4164_v28, %v1277_v35 }
 0x2b3   : > { %3554 = vtanh.f32 %v1278_v36  ;;  %v3182_v37 = vpop.f32.mrb[36].mxu0 }
 0x2b4   : > { %3556 = vtanh.f32 %v1283_v34  ;;  %v1293_v38 = vadd.f32 %v3182_v37, %v4164_v28  ;;  %v1287_v39 = vpop.f32.mrb[37].mxu0 }
 0x2b5   : > { %v1288_v40 = vadd.f32 %v4164_v28, %v1287_v39 }
 0x2b7   : > { %3558 = vtanh.f32 %v1288_v40  ;;  %v3185_v41 = vpop.f32.mrb[38].mxu0 }
 0x2b8   : > { %3560 = vtanh.f32 %v1293_v38  ;;  %v1303_v42 = vadd.f32 %v3185_v41, %v4164_v28  ;;  %v1297_v43 = vpop.f32.mrb[39].mxu0 }
 0x2b9   : > { %v3551_v44 = vpop.eup %3550  ;;  %v1298_v46 = vadd.f32 %v4164_v28, %v1297_v43 }
 0x2ba   : > { %v3553_v47 = vpop.eup %3552  ;;  %3230 = vmatprep.mubr.msk.f32.mxu1 %vm741_vm2, %v3551_v44 }
 0x2bb   : > { %3562 = vtanh.f32 %v1298_v46  ;;  %v3188_v48 = vpop.f32.mrb[40].mxu0  ;;  %3231 = vmatmul.mubr.msk.f32.vlgmr.msra.gmra.mrb[32].mxu1 %vm741_vm2, %v3553_v47 }
 0x2bc   : > { %3564 = vtanh.f32 %v1303_v42  ;;  %v1313_v49 = vadd.f32 %v3188_v48, %v4164_v28  ;;  %v1307_v50 = vpop.f32.mrb[41].mxu0  ;;  %3413 = vmatpush3.bf16.msra.mxu1 %v3410_v24 }
 0x2bd   : > { %v3555_v51 = vpop.eup %3554  ;;  %v1308_v52 = vadd.f32 %v4164_v28, %v1307_v50 }
 0x2be   : > { %v3557_v53 = vpop.eup %3556  ;;  %3233 = vmatprep.mubr.msk.f32.mxu1 %vm741_vm2, %v3555_v51 }
 0x2bf   : > { %3566 = vtanh.f32 %v1308_v52  ;;  %v3191_v54 = vpop.f32.mrb[42].mxu0  ;;  %3234 = vmatmul.mubr.msk.f32.gmra.mrb[34].mxu1 %vm741_vm2, %v3557_v53 }
 0x2c0   : > { %3568 = vtanh.f32 %v1313_v49  ;;  %v1323_v55 = vadd.f32 %v3191_v54, %v4164_v28  ;;  %v1317_v23 = vpop.f32.mrb[43].mxu0 }
 0x2c1   : > { %v3559_v56 = vpop.eup %3558  ;;  %v1318_v20 = vadd.f32 %v4164_v28, %v1317_v23 }
 0x2c2   : > { %v3561_v21 = vpop.eup %3560  ;;  %3236 = vmatprep.mubr.msk.f32.mxu1 %vm741_vm2, %v3559_v56 }
 0x2c3   : > { %3570 = vtanh.f32 %v1318_v20  ;;  %v3194_v24 = vpop.f32.mrb[44].mxu0  ;;  %3237 = vmatmul.mubr.msk.f32.gmra.mrb[36].mxu1 %vm741_vm2, %v3561_v21 }
 0x2c4   : > { %3572 = vtanh.f32 %v1323_v55  ;;  %v1333_v29 = vadd.f32 %v3194_v24, %v4164_v28  ;;  %v1327_v30 = vpop.f32.mrb[45].mxu0 }
 0x2c5   : > { %v3563_v31 = vpop.eup %3562  ;;  %v1328_v32 = vadd.f32 %v4164_v28, %v1327_v30 }
 0x2c6   : > { %v3565_v33 = vpop.eup %3564  ;;  %3239 = vmatprep.mubr.msk.f32.mxu1 %vm741_vm2, %v3563_v31 }
 0x2c7   : > { %3574 = vtanh.f32 %v1328_v32  ;;  %v3197_v34 = vpop.f32.mrb[46].mxu0  ;;  %3240 = vmatmul.mubr.msk.f32.gmra.mrb[38].mxu1 %vm741_vm2, %v3565_v33 }
 0x2c8   : > { %3576 = vtanh.f32 %v1333_v29  ;;  %v1343_v35 = vadd.f32 %v3197_v34, %v4164_v28  ;;  %v1337_v36 = vpop.f32.mrb[47].mxu0 }
 0x2c9   : > { %v3567_v37 = vpop.eup %3566  ;;  %v1338_v38 = vadd.f32 %v4164_v28, %v1337_v36 }
 0x2ca   : > { %v3569_v39 = vpop.eup %3568  ;;  %3242 = vmatprep.mubr.msk.f32.mxu1 %vm741_vm2, %v3567_v37 }
 0x2cb   : > { %3578 = vtanh.f32 %v1338_v38  ;;  %v3200_v40 = vpop.f32.mrb[48].mxu0  ;;  %3243 = vmatmul.mubr.msk.f32.gmra.mrb[40].mxu1 %vm741_vm2, %v3569_v39 }
 0x2cc   : > { %3580 = vtanh.f32 %v1343_v35  ;;  %v1353_v41 = vadd.f32 %v3200_v40, %v4164_v28  ;;  %v1347_v42 = vpop.f32.mrb[49].mxu0 }
 0x2cd   : > { %v3571_v43 = vpop.eup %3570  ;;  %v1348_v44 = vadd.f32 %v4164_v28, %v1347_v42 }
 0x2ce   : > { %v3573_v46 = vpop.eup %3572  ;;  %3245 = vmatprep.mubr.msk.f32.mxu1 %vm741_vm2, %v3571_v43 }
 0x2cf   : > { %3582 = vtanh.f32 %v1348_v44  ;;  %v3203_v47 = vpop.f32.mrb[50].mxu0  ;;  %3246 = vmatmul.mubr.msk.f32.gmra.mrb[42].mxu1 %vm741_vm2, %v3573_v46 }
 0x2d0   : > { %3584 = vtanh.f32 %v1353_v41  ;;  %v1363_v48 = vadd.f32 %v3203_v47, %v4164_v28  ;;  %v1357_v49 = vpop.f32.mrb[51].mxu0 }
 0x2d1   : > { %v3575_v50 = vpop.eup %3574  ;;  %v1358_v51 = vadd.f32 %v4164_v28, %v1357_v49 }
 0x2d2   : > { %v3577_v52 = vpop.eup %3576  ;;  %3248 = vmatprep.mubr.msk.f32.mxu1 %vm741_vm2, %v3575_v50 }
 0x2d3   : > { %3586 = vtanh.f32 %v1358_v51  ;;  %v3206_v53 = vpop.f32.mrb[52].mxu0  ;;  %3249 = vmatmul.mubr.msk.f32.gmra.mrb[44].mxu1 %vm741_vm2, %v3577_v52 }
 0x2d4   : > { %3588 = vtanh.f32 %v1363_v48  ;;  %v1373_v54 = vadd.f32 %v3206_v53, %v4164_v28  ;;  %v1367_v55 = vpop.f32.mrb[53].mxu0 }
 0x2d5   : > { %v3579_v23 = vpop.eup %3578  ;;  %v1368_v56 = vadd.f32 %v4164_v28, %v1367_v55 }
 0x2d6   : > { %v3581_v20 = vpop.eup %3580  ;;  %3251 = vmatprep.mubr.msk.f32.mxu1 %vm741_vm2, %v3579_v23 }
 0x2d7   : > { %3590 = vtanh.f32 %v1368_v56  ;;  %v3209_v21 = vpop.f32.mrb[54].mxu0  ;;  %3252 = vmatmul.mubr.msk.f32.gmra.mrb[46].mxu1 %vm741_vm2, %v3581_v20 }
 0x2d8   : > { %3592 = vtanh.f32 %v1373_v54  ;;  %v1383_v24 = vadd.f32 %v3209_v21, %v4164_v28  ;;  %v1377_v29 = vpop.f32.mrb[55].mxu0 }
 0x2d9   : > { %v3583_v30 = vpop.eup %3582  ;;  %v1378_v31 = vadd.f32 %v4164_v28, %v1377_v29 }
 0x2da   : > { %v3585_v32 = vpop.eup %3584  ;;  %3254 = vmatprep.mubr.msk.f32.mxu1 %vm741_vm2, %v3583_v30 }
 0x2db   : > { %3594 = vtanh.f32 %v1378_v31  ;;  %v3212_v33 = vpop.f32.mrb[56].mxu0  ;;  %3255 = vmatmul.mubr.msk.f32.gmra.mrb[48].mxu1 %vm741_vm2, %v3585_v32  ;;  %v4361_v31 = vld [vmem:[%s4595_s6 + $0x3] ss:$0 sm:$0xff] }
 0x2dc   : > { %3596 = vtanh.f32 %v1383_v24  ;;  %v1393_v34 = vadd.f32 %v3212_v33, %v4164_v28  ;;  %v1387_v35 = vpop.f32.mrb[57].mxu0 }
 0x2dd   : > { %v3587_v36 = vpop.eup %3586  ;;  %v1388_v37 = vadd.f32 %v4164_v28, %v1387_v35 }
 0x2de   : > { %v3589_v38 = vpop.eup %3588  ;;  %3257 = vmatprep.mubr.msk.f32.mxu1 %vm741_vm2, %v3587_v36 }
 0x2df   : > { %3598 = vtanh.f32 %v1388_v37  ;;  %v3215_v39 = vpop.f32.mrb[58].mxu0  ;;  %3258 = vmatmul.mubr.msk.f32.gmra.mrb[50].mxu1 %vm741_vm2, %v3589_v38 }
 0x2e0   : > { %3600 = vtanh.f32 %v1393_v34  ;;  %v1403_v40 = vadd.f32 %v3215_v39, %v4164_v28  ;;  %v1397_v41 = vpop.f32.mrb[59].mxu0 }
 0x2e1   : > { %v3591_v42 = vpop.eup %3590  ;;  %v1398_v43 = vadd.f32 %v4164_v28, %v1397_v41 }
 0x2e2   : > { %v3593_v44 = vpop.eup %3592  ;;  %3260 = vmatprep.mubr.msk.f32.mxu1 %vm741_vm2, %v3591_v42 }
 0x2e3   : > { %3602 = vtanh.f32 %v1398_v43  ;;  %v3218_v46 = vpop.f32.mrb[60].mxu0  ;;  %3261 = vmatmul.mubr.msk.f32.gmra.mrb[52].mxu1 %vm741_vm2, %v3593_v44 }
 0x2e4   : > { %3604 = vtanh.f32 %v1403_v40  ;;  %v1413_v47 = vadd.f32 %v3218_v46, %v4164_v28  ;;  %v1407_v48 = vpop.f32.mrb[61].mxu0 }
 0x2e5   : > { %v3595_v49 = vpop.eup %3594  ;;  %v1408_v50 = vadd.f32 %v4164_v28, %v1407_v48 }
 0x2e6   : > { %v3597_v51 = vpop.eup %3596  ;;  %3263 = vmatprep.mubr.msk.f32.mxu1 %vm741_vm2, %v3595_v49 }
 0x2e7   : > { %3606 = vtanh.f32 %v1408_v50  ;;  %v3221_v52 = vpop.f32.mrb[62].mxu0  ;;  %3264 = vmatmul.mubr.msk.f32.gmra.mrb[54].mxu1 %vm741_vm2, %v3597_v51 }
 0x2e8   : > { %3608 = vtanh.f32 %v1413_v47  ;;  %v1423_v53 = vadd.f32 %v3221_v52, %v4164_v28  ;;  %v1417_v54 = vpop.f32.mrb[63].mxu0 }
 0x2e9   : > { %v3599_v55 = vpop.eup %3598  ;;  %v1418_v23 = vadd.f32 %v4164_v28, %v1417_v54 }
 0x2ea   : > { %v3601_v56 = vpop.eup %3600  ;;  %3266 = vmatprep.mubr.msk.f32.mxu1 %vm741_vm2, %v3599_v55 }
 0x2eb   : > { %3610 = vtanh.f32 %v1418_v23  ;;  %3267 = vmatmul.mubr.msk.f32.gmra.mrb[56].mxu1 %vm741_vm2, %v3601_v56 }
 0x2ec   : > { %3612 = vtanh.f32 %v1423_v53 }
 0x2ed   : > { %v3603_v20 = vpop.eup %3602 }
 0x2ee   : > { %v3605_v21 = vpop.eup %3604  ;;  %3269 = vmatprep.mubr.msk.f32.mxu1 %vm741_vm2, %v3603_v20 }
 0x2ef   : > { %3270 = vmatmul.mubr.msk.f32.gmra.mrb[58].mxu1 %vm741_vm2, %v3605_v21 }
 0x2f1   : > { %v3607_v24 = vpop.eup %3606 }
 0x2f2   : > { %v3609_v29 = vpop.eup %3608  ;;  %3272 = vmatprep.mubr.msk.f32.mxu1 %vm741_vm2, %v3607_v24 }
 0x2f3   : > { %3273 = vmatmul.mubr.msk.f32.gmra.mrb[60].mxu1 %vm741_vm2, %v3609_v29 }
 0x2f5   : > { %v3611_v28 = vpop.eup %3610 }
 0x2f6   : > { %v3613_v30 = vpop.eup %3612  ;;  %3275 = vmatprep.mubr.msk.f32.mxu1 %vm741_vm2, %v3611_v28 }
 0x2f7   : > { %3276 = vmatmul.mubr.msk.f32.gmra.mrb[62].mxu1 %vm741_vm2, %v3613_v30 }
 0x2f8   : > { %3334 = vmatprep.mubr.msk.f32.mxu1 %vm1823_vm3, %v3996_v57  ;;  %v4264_v57 = vpop.f32.mrb[64].mxu0 }
 0x2fb   : > { %3335 = vmatmul.mubr.msk.f32.vlgmr.msra.gmra.mrb[64].mxu1 %vm1823_vm3, %v4001_v58  ;;  %v4268_v58 = vpop.f32.mrb[65].mxu0 }
 0x2fc   : > { %3337 = vmatprep.mubr.msk.f32.mxu1 %vm1823_vm3, %v4006_v59  ;;  %v4272_v59 = vpop.f32.mrb[66].mxu0 }
 0x2ff   : > { %3338 = vmatmul.mubr.msk.f32.gmra.mrb[66].mxu1 %vm1823_vm3, %v4011_v60  ;;  %v4276_v60 = vpop.f32.mrb[67].mxu0 }
 0x300   : > { %3340 = vmatprep.mubr.msk.f32.mxu1 %vm1823_vm3, %v4016_v61  ;;  %v4282_v61 = vpop.f32.mrb[68].mxu0 }
 0x303   : > { %3341 = vmatmul.mubr.msk.f32.gmra.mrb[68].mxu1 %vm1823_vm3, %v4021_v62  ;;  %v4286_v62 = vpop.f32.mrb[69].mxu0 }
 0x304   : > { %3343 = vmatprep.mubr.msk.f32.mxu1 %vm1823_vm3, %v4026_v63  ;;  %v4290_v63 = vpop.f32.mrb[70].mxu0 }
 0x307   : > { %3344 = vmatmul.mubr.msk.f32.gmra.mrb[70].mxu1 %vm1823_vm3, %v4031_v0  ;;  %v4294_v0 = vpop.f32.mrb[71].mxu0 }
 0x308   : > { %3346 = vmatprep.mubr.msk.f32.mxu1 %vm1823_vm3, %v4036_v1  ;;  %v4298_v1 = vpop.f32.mrb[72].mxu0 }
 0x30b   : > { %3347 = vmatmul.mubr.msk.f32.gmra.mrb[72].mxu1 %vm1823_vm3, %v4041_v2  ;;  %v4302_v2 = vpop.f32.mrb[73].mxu0 }
 0x30c   : > { %3349 = vmatprep.mubr.msk.f32.mxu1 %vm1823_vm3, %v4046_v3  ;;  %v4306_v3 = vpop.f32.mrb[74].mxu0 }
 0x30f   : > { %3350 = vmatmul.mubr.msk.f32.gmra.mrb[74].mxu1 %vm1823_vm3, %v4051_v4  ;;  %v4310_v4 = vpop.f32.mrb[75].mxu0 }
 0x310   : > { %3352 = vmatprep.mubr.msk.f32.mxu1 %vm1823_vm3, %v4056_v5  ;;  %v4314_v5 = vpop.f32.mrb[76].mxu0 }
 0x313   : > { %3353 = vmatmul.mubr.msk.f32.gmra.mrb[76].mxu1 %vm1823_vm3, %v4061_v6  ;;  %v4318_v6 = vpop.f32.mrb[77].mxu0 }
 0x314   : > { %3355 = vmatprep.mubr.msk.f32.mxu1 %vm1823_vm3, %v4066_v7  ;;  %v4322_v7 = vpop.f32.mrb[78].mxu0 }
 0x317   : > { %3356 = vmatmul.mubr.msk.f32.gmra.mrb[78].mxu1 %vm1823_vm3, %v4071_v8  ;;  %v4324_v8 = vpop.f32.mrb[79].mxu0 }
 0x318   : > { %3358 = vmatprep.mubr.msk.f32.mxu1 %vm1823_vm3, %v4076_v9  ;;  %v4326_v9 = vpop.f32.mrb[80].mxu0 }
 0x31b   : > { %3359 = vmatmul.mubr.msk.f32.gmra.mrb[80].mxu1 %vm1823_vm3, %v4081_v10  ;;  %v4328_v10 = vpop.f32.mrb[81].mxu0 }
 0x31c   : > { %3361 = vmatprep.mubr.msk.f32.mxu1 %vm1823_vm3, %v4086_v11  ;;  %v4330_v11 = vpop.f32.mrb[82].mxu0 }
 0x31f   : > { %3362 = vmatmul.mubr.msk.f32.gmra.mrb[82].mxu1 %vm1823_vm3, %v4091_v12  ;;  %v4332_v12 = vpop.f32.mrb[83].mxu0 }
 0x320   : > { %3364 = vmatprep.mubr.msk.f32.mxu1 %vm1823_vm3, %v4096_v13  ;;  %v4334_v13 = vpop.f32.mrb[84].mxu0 }
 0x323   : > { %3365 = vmatmul.mubr.msk.f32.gmra.mrb[84].mxu1 %vm1823_vm3, %v4101_v45  ;;  %v4336_v45 = vpop.f32.mrb[85].mxu0 }
 0x324   : > { %3367 = vmatprep.mubr.msk.f32.mxu1 %vm1823_vm3, %v4106_v14  ;;  %v4338_v14 = vpop.f32.mrb[86].mxu0 }
 0x327   : > { %3368 = vmatmul.mubr.msk.f32.gmra.mrb[86].mxu1 %vm1823_vm3, %v4111_v15  ;;  %v4340_v15 = vpop.f32.mrb[87].mxu0 }
 0x328   : > { %3370 = vmatprep.mubr.msk.f32.mxu1 %vm1823_vm3, %v4116_v16  ;;  %v4342_v16 = vpop.f32.mrb[88].mxu0 }
 0x32b   : > { %3371 = vmatmul.mubr.msk.f32.gmra.mrb[88].mxu1 %vm1823_vm3, %v4121_v17  ;;  %v4344_v17 = vpop.f32.mrb[89].mxu0 }
 0x32c   : > { %3373 = vmatprep.mubr.msk.f32.mxu1 %vm1823_vm3, %v4124_v18  ;;  %v4346_v18 = vpop.f32.mrb[90].mxu0 }
 0x32f   : > { %3374 = vmatmul.mubr.msk.f32.gmra.mrb[90].mxu1 %vm1823_vm3, %v4131_v19  ;;  %v4348_v19 = vpop.f32.mrb[91].mxu0 }
 0x330   : > { %3376 = vmatprep.mubr.msk.f32.mxu1 %vm1823_vm3, %v4140_v22  ;;  %v4350_v22 = vpop.f32.mrb[92].mxu0 }
 0x333   : > { %3377 = vmatmul.mubr.msk.f32.gmra.mrb[92].mxu1 %vm1823_vm3, %v4147_v25  ;;  %v4352_v25 = vpop.f32.mrb[93].mxu0 }
 0x334   : > { %3379 = vmatprep.mubr.msk.f32.mxu1 %vm1823_vm3, %v4150_v26  ;;  %v4354_v26 = vpop.f32.mrb[94].mxu0 }
 0x337   : > { %3380 = vmatmul.mubr.msk.f32.gmra.mrb[94].mxu1 %vm1823_vm3, %v4157_v27  ;;  %v4356_v27 = vpop.f32.mrb[95].mxu0 }
 0x38e   : > { %v3232_v32 = vpop.f32.mrb[32].mxu1 }
 0x38f   : > { %v1636_v33 = vadd.f32 %v3232_v32, %v4361_v31  ;;  %v1630_v34 = vpop.f32.mrb[33].mxu1 }
 0x390   : > { %v1631_v35 = vadd.f32 %v4361_v31, %v1630_v34 }
 0x391   : > { %3614 = vtanh.f32 %v1636_v33 }
 0x392   : > { %3616 = vtanh.f32 %v1631_v35  ;;  %v3235_v36 = vpop.f32.mrb[34].mxu1 }
 0x393   : > { %v1646_v37 = vadd.f32 %v3235_v36, %v4361_v31  ;;  %v1640_v38 = vpop.f32.mrb[35].mxu1 }
 0x394   : > { %v1641_v39 = vadd.f32 %v4361_v31, %v1640_v38 }
 0x395   : > { %3618 = vtanh.f32 %v1646_v37 }
 0x396   : > { %3620 = vtanh.f32 %v1641_v39  ;;  %v3238_v40 = vpop.f32.mrb[36].mxu1 }
 0x397   : > { %v1656_v41 = vadd.f32 %v3238_v40, %v4361_v31  ;;  %v1650_v42 = vpop.f32.mrb[37].mxu1 }
 0x398   : > { %v1651_v43 = vadd.f32 %v4361_v31, %v1650_v42 }
 0x399   : > { %3622 = vtanh.f32 %v1656_v41 }
 0x39a   : > { %3624 = vtanh.f32 %v1651_v43  ;;  %v3241_v44 = vpop.f32.mrb[38].mxu1 }
 0x39b   : > { %v3615_v46 = vpop.eup %3614  ;;  %v1666_v47 = vadd.f32 %v3241_v44, %v4361_v31  ;;  %v1660_v48 = vpop.f32.mrb[39].mxu1 }
 0x39c   : > { %v3617_v49 = vpop.eup %3616  ;;  %v2146_v50 = vmul.f32 %v3615_v46, %v4264_v57  ;;  %v1661_v51 = vadd.f32 %v4361_v31, %v1660_v48 }
 0x39d   : > { %3626 = vtanh.f32 %v1666_v47  ;;  %v2145_v52 = vmul.f32 %v3617_v49, %v4268_v58 }
 0x39e   : > { %3628 = vtanh.f32 %v1661_v51  ;;  %v3244_v53 = vpop.f32.mrb[40].mxu1  ;;  %v2180_v54 = vsel %vm741_vm2, %v2146_v50, 0.0 }
 0x39f   : > { %v3619_v55 = vpop.eup %3618  ;;  %v1676_v23 = vadd.f32 %v3244_v53, %v4361_v31  ;;  %v1670_v56 = vpop.f32.mrb[41].mxu1  ;;  %2181 = vadd.xlane.f32.xlu0 %v2180_v54  ;;  %v2177_v30 = vsel %vm741_vm2, %v2145_v52, 0.0 }
 0x3a0   : > { %v3621_v20 = vpop.eup %3620  ;;  %v2148_v21 = vmul.f32 %v3619_v55, %v4272_v59  ;;  %v1671_v24 = vadd.f32 %v4361_v31, %v1670_v56 }
 0x3a1   : > { %3630 = vtanh.f32 %v1676_v23  ;;  %v2147_v29 = vmul.f32 %v3621_v20, %v4276_v60 }
 0x3a2   : > { %3632 = vtanh.f32 %v1671_v24  ;;  %v3247_v28 = vpop.f32.mrb[42].mxu1  ;;  %v2186_v57 = vsel %vm741_vm2, %v2148_v21, 0.0 }
 0x3a3   : > { %v3623_v58 = vpop.eup %3622  ;;  %v1686_v32 = vadd.f32 %v3247_v28, %v4361_v31  ;;  %v1680_v33 = vpop.f32.mrb[43].mxu1  ;;  %2178 = vadd.xlane.f32.xlu0 %v2177_v30  ;;  %2187 = vadd.xlane.f32.xlu1 %v2186_v57  ;;  %v2183_v37 = vsel %vm741_vm2, %v2147_v29, 0.0 }
 0x3a4   : > { %v3625_v34 = vpop.eup %3624  ;;  %v1681_v59 = vadd.f32 %v4361_v31, %v1680_v33  ;;  %v2150_v35 = vmul.f32 %v3623_v58, %v4282_v61 }
 0x3a5   : > { %3634 = vtanh.f32 %v1686_v32  ;;  %v2149_v60 = vmul.f32 %v3625_v34, %v4286_v62 }
 0x3a6   : > { %3636 = vtanh.f32 %v1681_v59  ;;  %v3250_v36 = vpop.f32.mrb[44].mxu1  ;;  %v2192_v46 = vsel %vm741_vm2, %v2150_v35, 0.0 }
 0x3a7   : > { %v3627_v38 = vpop.eup %3626  ;;  %v1696_v39 = vadd.f32 %v3250_v36, %v4361_v31  ;;  %v1690_v40 = vpop.f32.mrb[45].mxu1  ;;  %2184 = vadd.xlane.f32.xlu1 %v2183_v37  ;;  %v2189_v41 = vsel %vm741_vm2, %v2149_v60, 0.0 }
 0x3a8   : > { %v3629_v42 = vpop.eup %3628  ;;  %v1691_v43 = vadd.f32 %v4361_v31, %v1690_v40  ;;  %v2152_v44 = vmul.f32 %v3627_v38, %v4290_v63  ;;  %2190 = vadd.xlane.f32.xlu0 %v2189_v41 }
 0x3a9   : > { %3638 = vtanh.f32 %v1696_v39  ;;  %v2151_v61 = vmul.f32 %v3629_v42, %v4294_v0 }
 0x3aa   : > { %3640 = vtanh.f32 %v1691_v43  ;;  %v3253_v62 = vpop.f32.mrb[46].mxu1  ;;  %v2198_v54 = vsel %vm741_vm2, %v2152_v44, 0.0 }
 0x3ab   : > { %v3631_v47 = vpop.eup %3630  ;;  %v1706_v48 = vadd.f32 %v3253_v62, %v4361_v31  ;;  %v1700_v49 = vpop.f32.mrb[47].mxu1  ;;  %2193 = vadd.xlane.f32.xlu1 %v2192_v46  ;;  %v2195_v50 = vsel %vm741_vm2, %v2151_v61, 0.0 }
 0x3ac   : > { %v3633_v51 = vpop.eup %3632  ;;  %v1701_v52 = vadd.f32 %v4361_v31, %v1700_v49  ;;  %v2154_v63 = vmul.f32 %v3631_v47, %v4298_v1  ;;  %2196 = vadd.xlane.f32.xlu0 %v2195_v50 }
 0x3ad   : > { %3642 = vtanh.f32 %v1706_v48  ;;  %v2153_v0 = vmul.f32 %v3633_v51, %v4302_v2 }
 0x3ae   : > { %3644 = vtanh.f32 %v1701_v52  ;;  %v3256_v53 = vpop.f32.mrb[48].mxu1  ;;  %v2204_v28 = vsel %vm741_vm2, %v2154_v63, 0.0 }
 0x3af   : > { %v3635_v55 = vpop.eup %3634  ;;  %v1716_v23 = vadd.f32 %v3256_v53, %v4361_v31  ;;  %v1710_v56 = vpop.f32.mrb[49].mxu1  ;;  %2199 = vadd.xlane.f32.xlu1 %v2198_v54  ;;  %v2201_v20 = vsel %vm741_vm2, %v2153_v0, 0.0 }
 0x3b0   : > { %v3637_v21 = vpop.eup %3636  ;;  %v1711_v24 = vadd.f32 %v4361_v31, %v1710_v56  ;;  %v2156_v1 = vmul.f32 %v3635_v55, %v4306_v3  ;;  %2202 = vadd.xlane.f32.xlu0 %v2201_v20 }
 0x3b1   : > { %3646 = vtanh.f32 %v1716_v23  ;;  %v2155_v2 = vmul.f32 %v3637_v21, %v4310_v4 }
 0x3b2   : > { %3648 = vtanh.f32 %v1711_v24  ;;  %v3259_v29 = vpop.f32.mrb[50].mxu1  ;;  %v2210_v35 = vsel %vm741_vm2, %v2156_v1, 0.0 }
 0x3b3   : > { %v3639_v30 = vpop.eup %3638  ;;  %v1726_v57 = vadd.f32 %v3259_v29, %v4361_v31  ;;  %v1720_v58 = vpop.f32.mrb[51].mxu1  ;;  %2205 = vadd.xlane.f32.xlu1 %v2204_v28  ;;  %v2207_v32 = vsel %vm741_vm2, %v2155_v2, 0.0 }
 0x3b4   : > { %v3641_v33 = vpop.eup %3640  ;;  %v1721_v34 = vadd.f32 %v4361_v31, %v1720_v58  ;;  %v2158_v3 = vmul.f32 %v3639_v30, %v4314_v5  ;;  %2208 = vadd.xlane.f32.xlu0 %v2207_v32 }
 0x3b5   : > { %3650 = vtanh.f32 %v1726_v57  ;;  %v2157_v4 = vmul.f32 %v3641_v33, %v4318_v6 }
 0x3b6   : > { %3652 = vtanh.f32 %v1721_v34  ;;  %v3262_v59 = vpop.f32.mrb[52].mxu1  ;;  %v2216_v42 = vsel %vm741_vm2, %v2158_v3, 0.0 }
 0x3b7   : > { %v3643_v60 = vpop.eup %3642  ;;  %v1736_v36 = vadd.f32 %v3262_v59, %v4361_v31  ;;  %v1730_v37 = vpop.f32.mrb[53].mxu1  ;;  %2211 = vadd.xlane.f32.xlu1 %v2210_v35  ;;  %v2213_v38 = vsel %vm741_vm2, %v2157_v4, 0.0 }
 0x3b8   : > { %v3645_v39 = vpop.eup %3644  ;;  %v1731_v40 = vadd.f32 %v4361_v31, %v1730_v37  ;;  %v2160_v5 = vmul.f32 %v3643_v60, %v4322_v7  ;;  %2214 = vadd.xlane.f32.xlu0 %v2213_v38 }
 0x3b9   : > { %3654 = vtanh.f32 %v1736_v36  ;;  %v2159_v6 = vmul.f32 %v3645_v39, %v4324_v8 }
 0x3ba   : > { %3656 = vtanh.f32 %v1731_v40  ;;  %v3265_v41 = vpop.f32.mrb[54].mxu1  ;;  %v2222_v49 = vsel %vm741_vm2, %v2160_v5, 0.0 }
 0x3bb   : > { %v3647_v43 = vpop.eup %3646  ;;  %v1746_v44 = vadd.f32 %v3265_v41, %v4361_v31  ;;  %v1740_v61 = vpop.f32.mrb[55].mxu1  ;;  %2217 = vadd.xlane.f32.xlu1 %v2216_v42  ;;  %v2219_v62 = vsel %vm741_vm2, %v2159_v6, 0.0 }
 0x3bc   : > { %v3649_v46 = vpop.eup %3648  ;;  %v1741_v47 = vadd.f32 %v4361_v31, %v1740_v61  ;;  %v2162_v7 = vmul.f32 %v3647_v43, %v4326_v9  ;;  %2220 = vadd.xlane.f32.xlu0 %v2219_v62 }
 0x3bd   : > { %3658 = vtanh.f32 %v1746_v44  ;;  %v2161_v8 = vmul.f32 %v3649_v46, %v4328_v10 }
 0x3be   : > { %3660 = vtanh.f32 %v1741_v47  ;;  %v3268_v48 = vpop.f32.mrb[56].mxu1  ;;  %v2228_v55 = vsel %vm741_vm2, %v2162_v7, 0.0 }
 0x3bf   : > { %v3651_v50 = vpop.eup %3650  ;;  %v1756_v51 = vadd.f32 %v3268_v48, %v4361_v31  ;;  %v1750_v52 = vpop.f32.mrb[57].mxu1  ;;  %2223 = vadd.xlane.f32.xlu1 %v2222_v49  ;;  %v2225_v63 = vsel %vm741_vm2, %v2161_v8, 0.0 }
 0x3c0   : > { %v3653_v0 = vpop.eup %3652  ;;  %v1751_v53 = vadd.f32 %v4361_v31, %v1750_v52  ;;  %v2164_v9 = vmul.f32 %v3651_v50, %v4330_v11  ;;  %2226 = vadd.xlane.f32.xlu0 %v2225_v63 }
 0x3c1   : > { %3662 = vtanh.f32 %v1756_v51  ;;  %v2163_v10 = vmul.f32 %v3653_v0, %v4332_v12 }
 0x3c2   : > { %3664 = vtanh.f32 %v1751_v53  ;;  %v3271_v54 = vpop.f32.mrb[58].mxu1  ;;  %v2234_v29 = vsel %vm741_vm2, %v2164_v9, 0.0 }
 0x3c3   : > { %v3655_v23 = vpop.eup %3654  ;;  %v1766_v56 = vadd.f32 %v3271_v54, %v4361_v31  ;;  %v1760_v20 = vpop.f32.mrb[59].mxu1  ;;  %2229 = vadd.xlane.f32.xlu1 %v2228_v55  ;;  %v2231_v21 = vsel %vm741_vm2, %v2163_v10, 0.0 }
 0x3c4   : > { %v3657_v24 = vpop.eup %3656  ;;  %v1761_v1 = vadd.f32 %v4361_v31, %v1760_v20  ;;  %v2166_v11 = vmul.f32 %v3655_v23, %v4334_v13  ;;  %2232 = vadd.xlane.f32.xlu0 %v2231_v21 }
 0x3c5   : > { %3666 = vtanh.f32 %v1766_v56  ;;  %v2165_v12 = vmul.f32 %v3657_v24, %v4336_v45 }
 0x3c6   : > { %3668 = vtanh.f32 %v1761_v1  ;;  %v3274_v2 = vpop.f32.mrb[60].mxu1  ;;  %v2240_v3 = vsel %vm741_vm2, %v2166_v11, 0.0 }
 0x3c7   : > { %v3659_v28 = vpop.eup %3658  ;;  %v1776_v30 = vadd.f32 %v3274_v2, %v4361_v31  ;;  %v1770_v57 = vpop.f32.mrb[61].mxu1  ;;  %2235 = vadd.xlane.f32.xlu1 %v2234_v29  ;;  %v2237_v58 = vsel %vm741_vm2, %v2165_v12, 0.0 }
 0x3c8   : > { %v3661_v32 = vpop.eup %3660  ;;  %v1771_v33 = vadd.f32 %v4361_v31, %v1770_v57  ;;  %v2168_v13 = vmul.f32 %v3659_v28, %v4338_v14  ;;  %2238 = vadd.xlane.f32.xlu0 %v2237_v58 }
 0x3c9   : > { %3670 = vtanh.f32 %v1776_v30  ;;  %v2167_v45 = vmul.f32 %v3661_v32, %v4340_v15 }
 0x3ca   : > { %3672 = vtanh.f32 %v1771_v33  ;;  %v3277_v34 = vpop.f32.mrb[62].mxu1  ;;  %v2246_v38 = vsel %vm741_vm2, %v2168_v13, 0.0 }
 0x3cb   : > { %v3663_v4 = vpop.eup %3662  ;;  %v1786_v59 = vadd.f32 %v3277_v34, %v4361_v31  ;;  %v1780_v35 = vpop.f32.mrb[63].mxu1  ;;  %2241 = vadd.xlane.f32.xlu1 %v2240_v3  ;;  %v2243_v60 = vsel %vm741_vm2, %v2167_v45, 0.0 }
 0x3cc   : > { %v3665_v36 = vpop.eup %3664  ;;  %v1781_v37 = vadd.f32 %v4361_v31, %v1780_v35  ;;  %v2170_v14 = vmul.f32 %v3663_v4, %v4342_v16  ;;  %2244 = vadd.xlane.f32.xlu0 %v2243_v60 }
 0x3cd   : > { %3674 = vtanh.f32 %v1786_v59  ;;  %v2169_v15 = vmul.f32 %v3665_v36, %v4344_v17 }
 0x3ce   : > { %3676 = vtanh.f32 %v1781_v37  ;;  %v4445_v39 = vpop.f32.mrb[64].mxu1  ;;  %v2252_v42 = vsel %vm741_vm2, %v2170_v14, 0.0 }
 0x3cf   : > { %v3667_v40 = vpop.eup %3666  ;;  %2247 = vadd.xlane.f32.xlu1 %v2246_v38  ;;  %v2249_v5 = vsel %vm741_vm2, %v2169_v15, 0.0  ;;  %v4448_v6 = vpop.f32.mrb[65].mxu1 }
 0x3d0   : > { %v3669_v41 = vpop.eup %3668  ;;  %v2172_v31 = vmul.f32 %v3667_v40, %v4346_v18  ;;  %2250 = vadd.xlane.f32.xlu0 %v2249_v5 }
 0x3d1   : > { %v2171_v16 = vmul.f32 %v3669_v41, %v4348_v19 }
 0x3d2   : > { %v3339_v17 = vpop.f32.mrb[66].mxu1  ;;  %v2258_v7 = vsel %vm741_vm2, %v2172_v31, 0.0 }
 0x3d3   : > { %v3671_v43 = vpop.eup %3670  ;;  %2253 = vadd.xlane.f32.xlu1 %v2252_v42  ;;  %v2255_v44 = vsel %vm741_vm2, %v2171_v16, 0.0  ;;  %v2351_v61 = vpop.f32.mrb[67].mxu1 }
 0x3d4   : > { %v3673_v62 = vpop.eup %3672  ;;  %v2174_v46 = vmul.f32 %v3671_v43, %v4350_v22  ;;  %2256 = vadd.xlane.f32.xlu0 %v2255_v44 }
 0x3d5   : > { %v2173_v47 = vmul.f32 %v3673_v62, %v4352_v25 }
 0x3d6   : > { %v3342_v18 = vpop.f32.mrb[68].mxu1  ;;  %v2264_v52 = vsel %vm741_vm2, %v2174_v46, 0.0 }
 0x3d7   : > { %v3675_v8 = vpop.eup %3674  ;;  %2259 = vadd.xlane.f32.xlu1 %v2258_v7  ;;  %v2261_v19 = vsel %vm741_vm2, %v2173_v47, 0.0  ;;  %v2361_v48 = vpop.f32.mrb[69].mxu1 }
 0x3d8   : > { %v3677_v49 = vpop.eup %3676  ;;  %v2176_v50 = vmul.f32 %v3675_v8, %v4354_v26  ;;  %2262 = vadd.xlane.f32.xlu0 %v2261_v19 }
 0x3d9   : > { %v2175_v51 = vmul.f32 %v3677_v49, %v4356_v27 }
 0x3da   : > { %v3345_v22 = vpop.f32.mrb[70].mxu1  ;;  %v2270_v0 = vsel %vm741_vm2, %v2176_v50, 0.0 }
 0x3db   : > { %2265 = vadd.xlane.f32.xlu1 %v2264_v52  ;;  %v2267_v25 = vsel %vm741_vm2, %v2175_v51, 0.0  ;;  %v2371_v63 = vpop.f32.mrb[71].mxu1 }
 0x3dc   : > { %2268 = vadd.xlane.f32.xlu0 %v2267_v25 }
 0x3de   : > { %v3348_v53 = vpop.f32.mrb[72].mxu1 }
 0x3df   : > { %2271 = vadd.xlane.f32.xlu1 %v2270_v0  ;;  %v2381_v9 = vpop.f32.mrb[73].mxu1 }
 0x3e2   : > { %v3351_v10 = vpop.f32.mrb[74].mxu1 }
 0x3e3   : > { %v2391_v54 = vpop.f32.mrb[75].mxu1 }
 0x3e6   : > { %v3354_v55 = vpop.f32.mrb[76].mxu1 }
 0x3e7   : > { %v2401_v26 = vpop.f32.mrb[77].mxu1 }
 0x3ea   : > { %v4463_v23 = vpop.f32.mrb[78].mxu1 }
 0x3eb   : > { %v2411_v27 = vpop.f32.mrb[79].mxu1 }
 0x3ee   : > { %v4465_v56 = vpop.f32.mrb[80].mxu1 }
 0x3ef   : > { %v4467_v20 = vpop.f32.mrb[81].mxu1 }
 0x3f2   : > { %v4469_v21 = vpop.f32.mrb[82].mxu1 }
 0x3f3   : > { %v4471_v24 = vpop.f32.mrb[83].mxu1 }
 0x3f6   : > { %v4473_v1 = vpop.f32.mrb[84].mxu1 }
 0x3f7   : > { %v4475_v11 = vpop.f32.mrb[85].mxu1 }
 0x3fa   : > { %v4477_v12 = vpop.f32.mrb[86].mxu1 }
 0x3fb   : > { %v4479_v2 = vpop.f32.mrb[87].mxu1 }
 0x3fe   : > { %v4481_v29 = vpop.f32.mrb[88].mxu1 }
 0x3ff   : > { %v4483_v28 = vpop.f32.mrb[89].mxu1 }
 0x402   : > { %v4485_v30 = vpop.f32.mrb[90].mxu1 }
 0x403   : > { %v4487_v57 = vpop.f32.mrb[91].mxu1 }
 0x406   : > { %v4489_v58 = vpop.f32.mrb[92].mxu1 }
 0x407   : > { %v4491_v32 = vpop.f32.mrb[93].mxu1 }
 0x40a   : > { %v4493_v33 = vpop.f32.mrb[94].mxu1 }
 0x40b   : > { %v4495_v13 = vpop.f32.mrb[95].mxu1 }
 0x42c   : > { %v2182_v45 = vpop.xlane.xlu0 %2181 }
 0x42d   : > { %v2501_v34 = vadd.f32 %v4445_v39, %v2182_v45 }
 0x42f   : > { %2534 = vst.msk [vmem:[%s4501_s13 + $0x8] sm:$0xff] %vm2532_vm4, %v2501_v34 }
 0x430   : > { %v2179_v3 = vpop.xlane.xlu0 %2178  ;;  %v2188_v4 = vpop.xlane.xlu1 %2187 }
 0x431   : > { %v2500_v59 = vadd.f32 %v4448_v6, %v2179_v3  ;;  %v2503_v35 = vadd.f32 %v3339_v17, %v2188_v4 }
 0x433   : > { %2533 = vst.msk [vmem:[%s4501_s13] sm:$0xff] %vm2532_vm4, %v2500_v59  ;;  %2536 = vst.msk [vmem:[%s4501_s13 + $0x18] sm:$0xff] %vm2532_vm4, %v2503_v35 }
 0x434   : > { %v2185_v60 = vpop.xlane.xlu1 %2184 }
 0x435   : > { %v2502_v36 = vadd.f32 %v2351_v61, %v2185_v60  ;;  %v2191_v37 = vpop.xlane.xlu0 %2190 }
 0x436   : > { %v2504_v14 = vadd.f32 %v2361_v48, %v2191_v37 }
 0x437   : > { %2535 = vst.msk [vmem:[%s4501_s13 + $0x10] sm:$0xff] %vm2532_vm4, %v2502_v36 }
 0x438   : > { %2537 = vst.msk [vmem:[%s4501_s13 + $0x20] sm:$0xff] %vm2532_vm4, %v2504_v14  ;;  %v2194_v15 = vpop.xlane.xlu1 %2193 }
 0x439   : > { %v2505_v38 = vadd.f32 %v3342_v18, %v2194_v15  ;;  %v2197_v39 = vpop.xlane.xlu0 %2196 }
 0x43a   : > { %v2506_v40 = vadd.f32 %v2371_v63, %v2197_v39 }
 0x43b   : > { %2538 = vst.msk [vmem:[%s4501_s13 + $0x28] sm:$0xff] %vm2532_vm4, %v2505_v38 }
 0x43c   : > { %2539 = vst.msk [vmem:[%s4501_s13 + $0x30] sm:$0xff] %vm2532_vm4, %v2506_v40  ;;  %v2200_v5 = vpop.xlane.xlu1 %2199 }
 0x43d   : > { %v2507_v6 = vadd.f32 %v3345_v22, %v2200_v5  ;;  %v2203_v41 = vpop.xlane.xlu0 %2202 }
 0x43e   : > { %v2508_v31 = vadd.f32 %v2381_v9, %v2203_v41 }
 0x43f   : > { %2540 = vst.msk [vmem:[%s4501_s13 + $0x38] sm:$0xff] %vm2532_vm4, %v2507_v6 }
 0x440   : > { %2541 = vst.msk [vmem:[%s4501_s13 + $0x40] sm:$0xff] %vm2532_vm4, %v2508_v31  ;;  %v2206_v16 = vpop.xlane.xlu1 %2205 }
 0x441   : > { %v2509_v42 = vadd.f32 %v3348_v53, %v2206_v16  ;;  %v2209_v17 = vpop.xlane.xlu0 %2208 }
 0x442   : > { %v2510_v43 = vadd.f32 %v2391_v54, %v2209_v17 }
 0x443   : > { %2542 = vst.msk [vmem:[%s4501_s13 + $0x48] sm:$0xff] %vm2532_vm4, %v2509_v42 }
 0x444   : > { %2543 = vst.msk [vmem:[%s4501_s13 + $0x50] sm:$0xff] %vm2532_vm4, %v2510_v43  ;;  %v2212_v44 = vpop.xlane.xlu1 %2211 }
 0x445   : > { %v2511_v61 = vadd.f32 %v3351_v10, %v2212_v44  ;;  %v2215_v62 = vpop.xlane.xlu0 %2214 }
 0x446   : > { %v2512_v46 = vadd.f32 %v2401_v26, %v2215_v62 }
 0x447   : > { %2544 = vst.msk [vmem:[%s4501_s13 + $0x58] sm:$0xff] %vm2532_vm4, %v2511_v61 }
 0x448   : > { %2545 = vst.msk [vmem:[%s4501_s13 + $0x60] sm:$0xff] %vm2532_vm4, %v2512_v46  ;;  %v2218_v47 = vpop.xlane.xlu1 %2217 }
 0x449   : > { %v2513_v7 = vadd.f32 %v3354_v55, %v2218_v47  ;;  %v2221_v18 = vpop.xlane.xlu0 %2220 }
 0x44a   : > { %v2514_v8 = vadd.f32 %v2411_v27, %v2221_v18 }
 0x44b   : > { %2546 = vst.msk [vmem:[%s4501_s13 + $0x68] sm:$0xff] %vm2532_vm4, %v2513_v7 }
 0x44c   : > { %2547 = vst.msk [vmem:[%s4501_s13 + $0x70] sm:$0xff] %vm2532_vm4, %v2514_v8  ;;  %v2224_v19 = vpop.xlane.xlu1 %2223 }
 0x44d   : > { %v2515_v48 = vadd.f32 %v4463_v23, %v2224_v19  ;;  %v2227_v49 = vpop.xlane.xlu0 %2226 }
 0x44e   : > { %v2516_v50 = vadd.f32 %v4467_v20, %v2227_v49 }
 0x44f   : > { %2548 = vst.msk [vmem:[%s4501_s13 + $0x78] sm:$0xff] %vm2532_vm4, %v2515_v48 }
 0x450   : > { %2549 = vst.msk [vmem:[%s4501_s13 + $0x80] sm:$0xff] %vm2532_vm4, %v2516_v50  ;;  %v2230_v51 = vpop.xlane.xlu1 %2229 }
 0x451   : > { %v2517_v52 = vadd.f32 %v4465_v56, %v2230_v51  ;;  %v2233_v22 = vpop.xlane.xlu0 %2232 }
 0x452   : > { %v2518_v25 = vadd.f32 %v4471_v24, %v2233_v22 }
 0x453   : > { %2550 = vst.msk [vmem:[%s4501_s13 + $0x88] sm:$0xff] %vm2532_vm4, %v2517_v52 }
 0x454   : > { %2551 = vst.msk [vmem:[%s4501_s13 + $0x90] sm:$0xff] %vm2532_vm4, %v2518_v25  ;;  %v2236_v63 = vpop.xlane.xlu1 %2235 }
 0x455   : > { %v2519_v0 = vadd.f32 %v4469_v21, %v2236_v63  ;;  %v2239_v53 = vpop.xlane.xlu0 %2238 }
 0x456   : > { %v2520_v9 = vadd.f32 %v4475_v11, %v2239_v53 }
 0x457   : > { %2552 = vst.msk [vmem:[%s4501_s13 + $0x98] sm:$0xff] %vm2532_vm4, %v2519_v0 }
 0x458   : > { %2553 = vst.msk [vmem:[%s4501_s13 + $0xa0] sm:$0xff] %vm2532_vm4, %v2520_v9  ;;  %v2242_v10 = vpop.xlane.xlu1 %2241 }
 0x459   : > { %v2521_v54 = vadd.f32 %v4473_v1, %v2242_v10  ;;  %v2245_v55 = vpop.xlane.xlu0 %2244 }
 0x45a   : > { %v2522_v26 = vadd.f32 %v4479_v2, %v2245_v55 }
 0x45b   : > { %2554 = vst.msk [vmem:[%s4501_s13 + $0xa8] sm:$0xff] %vm2532_vm4, %v2521_v54 }
 0x45c   : > { %2555 = vst.msk [vmem:[%s4501_s13 + $0xb0] sm:$0xff] %vm2532_vm4, %v2522_v26  ;;  %v2248_v23 = vpop.xlane.xlu1 %2247 }
 0x45d   : > { %v2523_v27 = vadd.f32 %v4477_v12, %v2248_v23  ;;  %v2251_v56 = vpop.xlane.xlu0 %2250 }
 0x45e   : > { %v2524_v20 = vadd.f32 %v4483_v28, %v2251_v56 }
 0x45f   : > { %2556 = vst.msk [vmem:[%s4501_s13 + $0xb8] sm:$0xff] %vm2532_vm4, %v2523_v27 }
 0x460   : > { %2557 = vst.msk [vmem:[%s4501_s13 + $0xc0] sm:$0xff] %vm2532_vm4, %v2524_v20  ;;  %v2254_v21 = vpop.xlane.xlu1 %2253 }
 0x461   : > { %v2525_v24 = vadd.f32 %v4481_v29, %v2254_v21  ;;  %v2257_v1 = vpop.xlane.xlu0 %2256 }
 0x462   : > { %v2526_v11 = vadd.f32 %v4487_v57, %v2257_v1 }
 0x463   : > { %2558 = vst.msk [vmem:[%s4501_s13 + $0xc8] sm:$0xff] %vm2532_vm4, %v2525_v24 }
 0x464   : > { %2559 = vst.msk [vmem:[%s4501_s13 + $0xd0] sm:$0xff] %vm2532_vm4, %v2526_v11  ;;  %v2260_v12 = vpop.xlane.xlu1 %2259 }
 0x465   : > { %v2527_v2 = vadd.f32 %v4485_v30, %v2260_v12  ;;  %v2263_v28 = vpop.xlane.xlu0 %2262 }
 0x466   : > { %v2528_v45 = vadd.f32 %v4491_v32, %v2263_v28 }
 0x467   : > { %2560 = vst.msk [vmem:[%s4501_s13 + $0xd8] sm:$0xff] %vm2532_vm4, %v2527_v2 }
 0x468   : > { %2561 = vst.msk [vmem:[%s4501_s13 + $0xe0] sm:$0xff] %vm2532_vm4, %v2528_v45  ;;  %v2266_v29 = vpop.xlane.xlu1 %2265 }
 0x469   : > { %v2529_v34 = vadd.f32 %v4489_v58, %v2266_v29  ;;  %v2269_v3 = vpop.xlane.xlu0 %2268 }
 0x46a   : > { %v2530_v57 = vadd.f32 %v4495_v13, %v2269_v3 }
 0x46b   : > { %2562 = vst.msk [vmem:[%s4501_s13 + $0xe8] sm:$0xff] %vm2532_vm4, %v2529_v34 }
 0x46c   : > { %2563 = vst.msk [vmem:[%s4501_s13 + $0xf0] sm:$0xff] %vm2532_vm4, %v2530_v57  ;;  %v2272_v4 = vpop.xlane.xlu1 %2271 }
 0x46d   : > { %v2531_v30 = vadd.f32 %v4493_v33, %v2272_v4 }
 0x46f   : > { %2564 = vst.msk [vmem:[%s4501_s13 + $0xf8] sm:$0xff] %vm2532_vm4, %v2531_v30 }
 0x470 PF: > { %s17_s24 = sadd.s32 1, %s3684_s24  }
 0x471   : > { %p14_p4 = scmp.ge.s32.totalorder %s17_s24, 5  }
 0x473   :  { %16 = sbr.rel (!%p14_p4) target bundleno = 1 (0x1), region = 83 }

</bundles_post_ra>
